<compile_context>
chip_gen: v7x
topology: tpu7x:2x2x1
jax: 0.10.0
libtpu: 0.0.40
codegen_flags: <defaults>
</compile_context>

<pallas_src>
import functools

import jax
import jax.numpy as jnp
from jax.experimental import pallas as pl
from jax.experimental.pallas import tpu as pltpu

# ----------------------------- small BERT config ----------------------------
VOCAB = 100
MAX_POS = 64
HIDDEN = 32
N_LAYERS = 2
N_HEADS = 2
INTERMEDIATE = 64
N_CLASS = 3
LN_EPS = 1e-12


# ------------------------------- kernel helpers -----------------------------
def _layer_norm(x, gamma, beta, eps=LN_EPS):
    # One-pass LayerNorm: E[x] and E[x^2] in a single traversal.
    m1 = jnp.mean(x, axis=-1, keepdims=True)
    m2 = jnp.mean(x * x, axis=-1, keepdims=True)
    var = jnp.maximum(m2 - m1 * m1, 0.0)
    return (x - m1) * jax.lax.rsqrt(var + eps) * gamma + beta


def _gelu(x):
    # TODO(synk): HF BERT "gelu" is erf-based; tanh-approx GELU used for clean EUP lowering.
    return jax.nn.gelu(x, approximate=True)


# ------------------------------- fused kernel -------------------------------
def bert_forward_kernel(num_heads, n_layers,
                        emb_ref, eg_ref, eb_ref,
                        wqkv_ref, bqkv_ref, wo_ref, bo_ref, ln1g_ref, ln1b_ref,
                        wi_ref, bi_ref, wf_ref, bf_ref, ln2g_ref, ln2b_ref,
                        out_ref):
    """One grid step == TB batch examples.  Everything stays in VMEM."""
    TB, S, H = emb_ref.shape
    dh = H // num_heads
    M = TB * S                                   # matmul M dimension
    bf16 = jnp.bfloat16
    f32 = jnp.float32

    # ---- embedding LayerNorm (gather + pos/type add already done wrapper-side) ----
    h = _layer_norm(emb_ref[...].reshape(M, H), eg_ref[...], eb_ref[...])   # (M, H) f32

    means = []
    # TODO(synk): at larger L, replace the static unroll with a layer grid axis /
    # lax.fori_loop and pipeline the stacked layer weights (memory_space=pl.ANY)
    # so only 1-2 layers are VMEM-resident (needed for v7x's 64 MiB at BERT-base).
    for li in range(n_layers):
        hb = h.astype(bf16)
        # ---- fused QKV: ONE 2-D matmul; 1/sqrt(dh) pre-folded into Q cols/bias ----
        qkv = jnp.dot(hb, wqkv_ref[li], preferred_element_type=f32) + bqkv_ref[li]  # (M, 3H)

        wo_l = wo_ref[li]                                     # (nH, dh, H) bf16
        attn = bo_ref[li]                                     # (1, H) -> broadcasts
        for n in range(num_heads):                            # nH=2, static unroll
            qn = qkv[:, 0 * H + n * dh: 0 * H + (n + 1) * dh].reshape(TB, S, dh)
            kn = qkv[:, 1 * H + n * dh: 1 * H + (n + 1) * dh].reshape(TB, S, dh)
            vn = qkv[:, 2 * H + n * dh: 2 * H + (n + 1) * dh].reshape(TB, S, dh)

            s = jnp.einsum('bqd,bkd->bqk', qn.astype(bf16), kn.astype(bf16),
                           preferred_element_type=f32)        # (TB, S, S)
            s = s - jnp.max(s, axis=-1, keepdims=True)
            p = jnp.exp(s)
            p = p / jnp.sum(p, axis=-1, keepdims=True)        # exact softmax
            ctx = jnp.einsum('bqk,bkd->bqd', p.astype(bf16), vn.astype(bf16),
                             preferred_element_type=f32)      # (TB, S, dh)

            # head-sum folded into the contraction: per-head (M,dh)@(dh,H) partials
            # accumulate in f32 (no (nH,S,H) intermediate, no separate reduction).
            attn = attn + jnp.dot(ctx.reshape(M, dh).astype(bf16), wo_l[n],
                                  preferred_element_type=f32)

        h1 = _layer_norm(attn + h, ln1g_ref[li], ln1b_ref[li])

        # ---- feed-forward ----
        inter = _gelu(jnp.dot(h1.astype(bf16), wi_ref[li],
                              preferred_element_type=f32) + bi_ref[li])
        ffn = jnp.dot(inter.astype(bf16), wf_ref[li],
                      preferred_element_type=f32) + bf_ref[li]
        h = _layer_norm(ffn + h1, ln2g_ref[li], ln2b_ref[li])

        means.append(jnp.mean(h.reshape(TB, S, H), axis=1))   # (TB, H) per-layer seq mean

    cls = h.reshape(TB, S, H)[:, 0:1, :].reshape(TB, H)       # (TB, H)
    # hidden.mean(1) of the final hidden state == last layer's sequence mean.
    packed = jnp.concatenate([cls] + means + [means[-1]], axis=1)     # (TB, (L+2)*H)
    out_ref[...] = packed.reshape(1, TB, (n_layers + 2) * H)          # lane-dense slab


# ------------------------------ pallas wrapper -------------------------------
def _const_index_map(ndim):
    def imap(i):
        return (0,) * ndim
    return imap


def _resident_spec(a):
    # Full-array block, constant index map: stays VMEM-resident across the grid.
    return pl.BlockSpec(tuple(a.shape), _const_index_map(a.ndim))


def _pick_batch_tile(B, S, target_rows=256):
    """TB examples per grid step so TB*S ~ 128-256 matmul rows, while keeping
    >=2 grid steps when B >= 2 (v7x: shard the parallel axis over both TCs)."""
    tb = max(1, min(B, target_rows // S))
    while B % tb:
        tb -= 1
    if B // tb < 2 and tb > 1:
        tb = max(1, tb // 2)
        while B % tb:
            tb -= 1
    return tb


@jax.jit
def baseline_forward(packed, input_ids):
    """Mirrors BaseLine.forward(inps):
       returns (hidden[:, 0], [mean over seq of each layer output], hidden.mean(1)).
       No attention mask / token_type_ids==0, matching BertModel(inps) defaults."""
    B, S = input_ids.shape
    H, L = HIDDEN, N_LAYERS
    out_w = (L + 2) * H                                  # 128: lane-dense output slab

    # Vocab gather + position/type embedding add in plain XLA (kernel fuses the
    # rest: embedding LN, all encoder layers, CLS / per-layer sequence means).
    emb = (packed['word_emb'][input_ids.astype(jnp.int32)]
           + packed['pos_emb'][:S][None, :, :]
           + packed['type_emb'][0][None, None, :]).astype(jnp.float32)   # (B, S, H)

    TB = _pick_batch_tile(B, S)
    n_tiles = B // TB

    weights = [packed['emb_ln_g'], packed['emb_ln_b'],
               packed['wqkv'], packed['bqkv'], packed['wo'], packed['bo'],
               packed['ln1_g'], packed['ln1_b'],
               packed['wi'], packed['bi'], packed['wf'], packed['bf'],
               packed['ln2_g'], packed['ln2_b']]

    in_specs = ([pl.BlockSpec((TB, S, H), lambda i: (i, 0, 0))]
                + [_resident_spec(w) for w in weights])

    out = pl.pallas_call(
        functools.partial(bert_forward_kernel, N_HEADS, L),
        out_shape=jax.ShapeDtypeStruct((n_tiles, TB, out_w), jnp.float32),
        grid=(n_tiles,),
        in_specs=in_specs,
        out_specs=pl.BlockSpec((1, TB, out_w), lambda i: (i, 0, 0)),
        compiler_params=pltpu.CompilerParams(
            dimension_semantics=("parallel",),        # shard batch tiles over TCs
            vmem_limit_bytes=32 * 1024 * 1024),
    )(emb, *weights)

    out = out.reshape(B, out_w)
    cls = out[:, 0:H]
    layer_means = [out[:, (1 + i) * H:(2 + i) * H] for i in range(L)]
    overall_mean = out[:, (L + 1) * H:(L + 2) * H]
    return cls, layer_means, overall_mean


# ------------------------------ parameter setup ------------------------------
def init_params(key):
    def normal(key, shape, std=0.02):
        return (std * jax.random.normal(key, shape)).astype(jnp.float32)

    keys = jax.random.split(key, 8 + N_LAYERS)
    params = {
        'word_emb': normal(keys[0], (VOCAB, HIDDEN)),
        'pos_emb': normal(keys[1], (MAX_POS, HIDDEN)),
        'type_emb': normal(keys[2], (2, HIDDEN)),
        'emb_ln_g': jnp.ones((1, HIDDEN), jnp.float32),
        'emb_ln_b': jnp.zeros((1, HIDDEN), jnp.float32),
        # classifier exists in the module but is unused by forward()
        'classifier_w': (jnp.sqrt(2.0 / HIDDEN)
                         * jax.random.normal(keys[3], (HIDDEN, N_CLASS))).astype(jnp.float32),
        'classifier_b': jnp.zeros((N_CLASS,), jnp.float32),
        'layers': [],
    }
    for li in range(N_LAYERS):
        lk = jax.random.split(keys[8 + li], 8)
        params['layers'].append({
            'wq': normal(lk[0], (HIDDEN, HIDDEN)),
            'bq': jnp.zeros((1, HIDDEN), jnp.float32),
            'wk': normal(lk[1], (HIDDEN, HIDDEN)),
            'bk': jnp.zeros((1, HIDDEN), jnp.float32),
            'wv': normal(lk[2], (HIDDEN, HIDDEN)),
            'bv': jnp.zeros((1, HIDDEN), jnp.float32),
            'wo': normal(lk[3], (HIDDEN, HIDDEN)),
            'bo': jnp.zeros((1, HIDDEN), jnp.float32),
            'ln1_g': jnp.ones((1, HIDDEN), jnp.float32),
            'ln1_b': jnp.zeros((1, HIDDEN), jnp.float32),
            'wi': normal(lk[4], (HIDDEN, INTERMEDIATE)),
            'bi': jnp.zeros((1, INTERMEDIATE), jnp.float32),
            'wf': normal(lk[5], (INTERMEDIATE, HIDDEN)),
            'bf': jnp.zeros((1, HIDDEN), jnp.float32),
            'ln2_g': jnp.ones((1, HIDDEN), jnp.float32),
            'ln2_b': jnp.zeros((1, HIDDEN), jnp.float32),
        })
    return params


def pack_params(params):
    """One-time wrapper-side weight layout prep:
       - stack per-layer params along a leading layer axis,
       - fuse Q/K/V column-wise into one (H, 3H) matrix per layer,
       - fold 1/sqrt(dh) into the Q columns / bias,
       - split Wo rows per head -> (L, nH, dh, H) so the head sum folds into
         the output-projection contraction,
       - cast matmul weights to bf16 (biases / LN params stay f32)."""
    L = len(params['layers'])
    nH = N_HEADS
    dh = HIDDEN // nH
    scale = 1.0 / (dh ** 0.5)

    def stack(name, dtype=jnp.float32):
        return jnp.stack([params['layers'][i][name] for i in range(L)]).astype(dtype)

    wqkv, bqkv, wo = [], [], []
    for lyr in params['layers']:
        wqkv.append(jnp.concatenate([lyr['wq'] * scale, lyr['wk'], lyr['wv']], axis=1))
        bqkv.append(jnp.concatenate([lyr['bq'] * scale, lyr['bk'], lyr['bv']], axis=1))
        wo.append(lyr['wo'].reshape(nH, dh, HIDDEN))   # input rows = [h0 dh | h1 dh]

    return {
        'word_emb': params['word_emb'],
        'pos_emb': params['pos_emb'],
        'type_emb': params['type_emb'],
        'emb_ln_g': params['emb_ln_g'],
        'emb_ln_b': params['emb_ln_b'],
        'wqkv': jnp.stack(wqkv).astype(jnp.bfloat16),   # (L, H, 3H)
        'bqkv': jnp.stack(bqkv).astype(jnp.float32),    # (L, 1, 3H)
        'wo': jnp.stack(wo).astype(jnp.bfloat16),       # (L, nH, dh, H)
        'bo': stack('bo'),                              # (L, 1, H)
        'ln1_g': stack('ln1_g'), 'ln1_b': stack('ln1_b'),
        'wi': stack('wi', jnp.bfloat16),                # (L, H, I)
        'bi': stack('bi'),                              # (L, 1, I)
        'wf': stack('wf', jnp.bfloat16),                # (L, I, H)
        'bf': stack('bf'),                              # (L, 1, H)
        'ln2_g': stack('ln2_g'), 'ln2_b': stack('ln2_b'),
    }


# ----------------------------------- main ------------------------------------
if __name__ == "__main__":
    key = jax.random.PRNGKey(0)
    pkey, ikey = jax.random.split(key)
    params = init_params(pkey)
    packed = pack_params(params)

    B, S = 2, 8
    input_ids = jax.random.randint(ikey, (B, S), 0, VOCAB, dtype=jnp.int32)

    cls, layer_means, overall_mean = baseline_forward(packed, input_ids)
    jax.block_until_ready((cls, layer_means, overall_mean))

    assert cls.shape == (B, HIDDEN)
    assert len(layer_means) == N_LAYERS and all(m.shape == (B, HIDDEN) for m in layer_means)
    assert overall_mean.shape == (B, HIDDEN)
    print("KERNEL_OK")
</pallas_src>

<mosaic_0001>
module attributes {stable_mosaic.version = 11 : i64} {
  func.func @bert_forward_kernel(%arg0: i32, %arg1: memref<1x8x32xf32, #tpu.memory_space<vmem>>, %arg2: memref<1x32xf32, #tpu.memory_space<vmem>>, %arg3: memref<1x32xf32, #tpu.memory_space<vmem>>, %arg4: memref<2x32x96xbf16, #tpu.memory_space<vmem>>, %arg5: memref<2x1x96xf32, #tpu.memory_space<vmem>>, %arg6: memref<2x2x16x32xbf16, #tpu.memory_space<vmem>>, %arg7: memref<2x1x32xf32, #tpu.memory_space<vmem>>, %arg8: memref<2x1x32xf32, #tpu.memory_space<vmem>>, %arg9: memref<2x1x32xf32, #tpu.memory_space<vmem>>, %arg10: memref<2x32x64xbf16, #tpu.memory_space<vmem>>, %arg11: memref<2x1x64xf32, #tpu.memory_space<vmem>>, %arg12: memref<2x64x32xbf16, #tpu.memory_space<vmem>>, %arg13: memref<2x1x32xf32, #tpu.memory_space<vmem>>, %arg14: memref<2x1x32xf32, #tpu.memory_space<vmem>>, %arg15: memref<2x1x32xf32, #tpu.memory_space<vmem>>, %arg16: memref<1x1x128xf32, #tpu.memory_space<vmem>>) attributes {dimension_semantics = [#tpu.dimension_semantics<parallel>], iteration_bounds = array<i64: 2>, scalar_prefetch = 0 : i64, scratch_operands = 0 : i64, tpu.core_type = #tpu.core_type<tc>, window_params = [{transform_indices = @transform_0, window_bounds = array<i64: 1, 8, 32>}, {pipeline_mode = #tpu.pipeline_mode<synchronous>, transform_indices = @transform_1, window_bounds = array<i64: 1, 32>}, {pipeline_mode = #tpu.pipeline_mode<synchronous>, transform_indices = @transform_2, window_bounds = array<i64: 1, 32>}, {pipeline_mode = #tpu.pipeline_mode<synchronous>, transform_indices = @transform_3, window_bounds = array<i64: 2, 32, 96>}, {pipeline_mode = #tpu.pipeline_mode<synchronous>, transform_indices = @transform_4, window_bounds = array<i64: 2, 1, 96>}, {pipeline_mode = #tpu.pipeline_mode<synchronous>, transform_indices = @transform_5, window_bounds = array<i64: 2, 2, 16, 32>}, {pipeline_mode = #tpu.pipeline_mode<synchronous>, transform_indices = @transform_6, window_bounds = array<i64: 2, 1, 32>}, {pipeline_mode = #tpu.pipeline_mode<synchronous>, transform_indices = @transform_7, window_bounds = array<i64: 2, 1, 32>}, {pipeline_mode = #tpu.pipeline_mode<synchronous>, transform_indices = @transform_8, window_bounds = array<i64: 2, 1, 32>}, {pipeline_mode = #tpu.pipeline_mode<synchronous>, transform_indices = @transform_9, window_bounds = array<i64: 2, 32, 64>}, {pipeline_mode = #tpu.pipeline_mode<synchronous>, transform_indices = @transform_10, window_bounds = array<i64: 2, 1, 64>}, {pipeline_mode = #tpu.pipeline_mode<synchronous>, transform_indices = @transform_11, window_bounds = array<i64: 2, 64, 32>}, {pipeline_mode = #tpu.pipeline_mode<synchronous>, transform_indices = @transform_12, window_bounds = array<i64: 2, 1, 32>}, {pipeline_mode = #tpu.pipeline_mode<synchronous>, transform_indices = @transform_13, window_bounds = array<i64: 2, 1, 32>}, {pipeline_mode = #tpu.pipeline_mode<synchronous>, transform_indices = @transform_14, window_bounds = array<i64: 2, 1, 32>}, {transform_indices = @transform_15, window_bounds = array<i64: 1, 1, 128>}]} {
    %c0 = arith.constant 0 : index
    %c0_0 = arith.constant 0 : index
    %c0_1 = arith.constant 0 : index
    %0 = vector.load %arg1[%c0, %c0_0, %c0_1] : memref<1x8x32xf32, #tpu.memory_space<vmem>>, vector<1x8x32xf32>
    %1 = vector.shape_cast %0 : vector<1x8x32xf32> to vector<8x32xf32>
    %c0_2 = arith.constant 0 : index
    %c0_3 = arith.constant 0 : index
    %2 = vector.load %arg2[%c0_2, %c0_3] : memref<1x32xf32, #tpu.memory_space<vmem>>, vector<1x32xf32>
    %c0_4 = arith.constant 0 : index
    %c0_5 = arith.constant 0 : index
    %3 = vector.load %arg3[%c0_4, %c0_5] : memref<1x32xf32, #tpu.memory_space<vmem>>, vector<1x32xf32>
    %cst = arith.constant dense<0.000000e+00> : vector<8xf32>
    %4 = vector.multi_reduction <add>, %1, %cst [1] : vector<8x32xf32> to vector<8xf32>
    %5 = vector.shape_cast %4 : vector<8xf32> to vector<8x1xf32>
    %cst_6 = arith.constant 3.200000e+01 : f32
    %6 = vector.broadcast %cst_6 : f32 to vector<8x1xf32>
    %7 = arith.divf %5, %6 : vector<8x1xf32>
    %8 = arith.mulf %1, %1 : vector<8x32xf32>
    %cst_7 = arith.constant dense<0.000000e+00> : vector<8xf32>
    %9 = vector.multi_reduction <add>, %8, %cst_7 [1] : vector<8x32xf32> to vector<8xf32>
    %10 = vector.shape_cast %9 : vector<8xf32> to vector<8x1xf32>
    %cst_8 = arith.constant 3.200000e+01 : f32
    %11 = vector.broadcast %cst_8 : f32 to vector<8x1xf32>
    %12 = arith.divf %10, %11 : vector<8x1xf32>
    %13 = arith.mulf %7, %7 : vector<8x1xf32>
    %14 = arith.subf %12, %13 : vector<8x1xf32>
    %cst_9 = arith.constant 0.000000e+00 : f32
    %15 = vector.broadcast %cst_9 : f32 to vector<8x1xf32>
    %16 = arith.maximumf %14, %15 : vector<8x1xf32>
    %17 = vector.broadcast %7 : vector<8x1xf32> to vector<8x32xf32>
    %18 = arith.subf %1, %17 : vector<8x32xf32>
    %cst_10 = arith.constant 9.99999996E-13 : f32
    %19 = vector.broadcast %cst_10 : f32 to vector<8x1xf32>
    %20 = arith.addf %16, %19 : vector<8x1xf32>
    %21 = math.rsqrt %20 : vector<8x1xf32>
    %22 = vector.broadcast %21 : vector<8x1xf32> to vector<8x32xf32>
    %23 = arith.mulf %18, %22 : vector<8x32xf32>
    %24 = vector.broadcast %2 : vector<1x32xf32> to vector<8x32xf32>
    %25 = arith.mulf %23, %24 : vector<8x32xf32>
    %26 = vector.broadcast %3 : vector<1x32xf32> to vector<8x32xf32>
    %27 = arith.addf %25, %26 : vector<8x32xf32>
    %28 = arith.truncf %27 : vector<8x32xf32> to vector<8x32xbf16>
    %c0_11 = arith.constant 0 : index
    %c0_12 = arith.constant 0 : index
    %c0_13 = arith.constant 0 : index
    %29 = vector.load %arg4[%c0_11, %c0_12, %c0_13] : memref<2x32x96xbf16, #tpu.memory_space<vmem>>, vector<1x32x96xbf16>
    %30 = vector.shape_cast %29 : vector<1x32x96xbf16> to vector<32x96xbf16>
    %cst_14 = arith.constant dense<0.000000e+00> : vector<8x96xf32>
    %31 = tpu.matmul %28, %30, %cst_14 {dimension_numbers = #tpu.dot_dimension_numbers<[1], [0], [0], [1], [0, 0, 1, 1], [], []>} : vector<8x32xbf16>, vector<32x96xbf16>, vector<8x96xf32> -> vector<8x96xf32>
    %c0_15 = arith.constant 0 : index
    %c0_16 = arith.constant 0 : index
    %c0_17 = arith.constant 0 : index
    %32 = vector.load %arg5[%c0_15, %c0_16, %c0_17] : memref<2x1x96xf32, #tpu.memory_space<vmem>>, vector<1x1x96xf32>
    %33 = vector.shape_cast %32 : vector<1x1x96xf32> to vector<1x96xf32>
    %34 = vector.broadcast %33 : vector<1x96xf32> to vector<8x96xf32>
    %35 = arith.addf %31, %34 : vector<8x96xf32>
    %c0_18 = arith.constant 0 : index
    %c0_19 = arith.constant 0 : index
    %c0_20 = arith.constant 0 : index
    %c0_21 = arith.constant 0 : index
    %36 = vector.load %arg6[%c0_18, %c0_19, %c0_20, %c0_21] : memref<2x2x16x32xbf16, #tpu.memory_space<vmem>>, vector<1x2x16x32xbf16>
    %37 = vector.shape_cast %36 : vector<1x2x16x32xbf16> to vector<2x16x32xbf16>
    %c0_22 = arith.constant 0 : index
    %c0_23 = arith.constant 0 : index
    %c0_24 = arith.constant 0 : index
    %38 = vector.load %arg7[%c0_22, %c0_23, %c0_24] : memref<2x1x32xf32, #tpu.memory_space<vmem>>, vector<1x1x32xf32>
    %39 = vector.shape_cast %38 : vector<1x1x32xf32> to vector<1x32xf32>
    %40 = vector.extract_strided_slice %35 {offsets = [0, 0], sizes = [8, 16], strides = [1, 1]} : vector<8x96xf32> to vector<8x16xf32>
    %41 = vector.shape_cast %40 : vector<8x16xf32> to vector<1x8x16xf32>
    %42 = vector.extract_strided_slice %35 {offsets = [0, 32], sizes = [8, 16], strides = [1, 1]} : vector<8x96xf32> to vector<8x16xf32>
    %43 = vector.shape_cast %42 : vector<8x16xf32> to vector<1x8x16xf32>
    %44 = vector.extract_strided_slice %35 {offsets = [0, 64], sizes = [8, 16], strides = [1, 1]} : vector<8x96xf32> to vector<8x16xf32>
    %45 = vector.shape_cast %44 : vector<8x16xf32> to vector<1x8x16xf32>
    %46 = arith.truncf %41 : vector<1x8x16xf32> to vector<1x8x16xbf16>
    %47 = arith.truncf %43 : vector<1x8x16xf32> to vector<1x8x16xbf16>
    "tpu.trace_start"() <{level = 10 : i32, message = "bqd,bkd->bqk"}> : () -> ()
    %cst_25 = arith.constant dense<0.000000e+00> : vector<1x8x8xf32>
    %48 = tpu.matmul %46, %47, %cst_25 {dimension_numbers = #tpu.dot_dimension_numbers<[2], [2], [1], [1], [0, 0, 0, 1, 1, 1], [0], [0]>} : vector<1x8x16xbf16>, vector<1x8x16xbf16>, vector<1x8x8xf32> -> vector<1x8x8xf32>
    "tpu.trace_stop"() : () -> ()
    %cst_26 = arith.constant dense<0xFF800000> : vector<1x8xf32>
    %49 = vector.multi_reduction <maximumf>, %48, %cst_26 [2] : vector<1x8x8xf32> to vector<1x8xf32>
    %50 = vector.shape_cast %49 : vector<1x8xf32> to vector<1x8x1xf32>
    %51 = vector.broadcast %50 : vector<1x8x1xf32> to vector<1x8x8xf32>
    %52 = arith.subf %48, %51 : vector<1x8x8xf32>
    %53 = math.exp %52 : vector<1x8x8xf32>
    %cst_27 = arith.constant dense<0.000000e+00> : vector<1x8xf32>
    %54 = vector.multi_reduction <add>, %53, %cst_27 [2] : vector<1x8x8xf32> to vector<1x8xf32>
    %55 = vector.shape_cast %54 : vector<1x8xf32> to vector<1x8x1xf32>
    %56 = vector.broadcast %55 : vector<1x8x1xf32> to vector<1x8x8xf32>
    %57 = arith.divf %53, %56 : vector<1x8x8xf32>
    %58 = arith.truncf %57 : vector<1x8x8xf32> to vector<1x8x8xbf16>
    %59 = arith.truncf %45 : vector<1x8x16xf32> to vector<1x8x16xbf16>
    "tpu.trace_start"() <{level = 10 : i32, message = "bqk,bkd->bqd"}> : () -> ()
    %cst_28 = arith.constant dense<0.000000e+00> : vector<1x8x16xf32>
    %60 = tpu.matmul %58, %59, %cst_28 {dimension_numbers = #tpu.dot_dimension_numbers<[2], [1], [1], [2], [0, 0, 0, 1, 1, 2], [0], [0]>} : vector<1x8x8xbf16>, vector<1x8x16xbf16>, vector<1x8x16xf32> -> vector<1x8x16xf32>
    "tpu.trace_stop"() : () -> ()
    %61 = vector.shape_cast %60 : vector<1x8x16xf32> to vector<8x16xf32>
    %62 = arith.truncf %61 : vector<8x16xf32> to vector<8x16xbf16>
    %63 = vector.extract_strided_slice %37 {offsets = [0, 0, 0], sizes = [1, 16, 32], strides = [1, 1, 1]} : vector<2x16x32xbf16> to vector<1x16x32xbf16>
    %64 = vector.shape_cast %63 : vector<1x16x32xbf16> to vector<16x32xbf16>
    %cst_29 = arith.constant dense<0.000000e+00> : vector<8x32xf32>
    %65 = tpu.matmul %62, %64, %cst_29 {dimension_numbers = #tpu.dot_dimension_numbers<[1], [0], [0], [1], [0, 0, 1, 1], [], []>} : vector<8x16xbf16>, vector<16x32xbf16>, vector<8x32xf32> -> vector<8x32xf32>
    %66 = vector.broadcast %39 : vector<1x32xf32> to vector<8x32xf32>
    %67 = arith.addf %66, %65 : vector<8x32xf32>
    %68 = vector.extract_strided_slice %35 {offsets = [0, 16], sizes = [8, 16], strides = [1, 1]} : vector<8x96xf32> to vector<8x16xf32>
    %69 = vector.shape_cast %68 : vector<8x16xf32> to vector<1x8x16xf32>
    %70 = vector.extract_strided_slice %35 {offsets = [0, 48], sizes = [8, 16], strides = [1, 1]} : vector<8x96xf32> to vector<8x16xf32>
    %71 = vector.shape_cast %70 : vector<8x16xf32> to vector<1x8x16xf32>
    %72 = vector.extract_strided_slice %35 {offsets = [0, 80], sizes = [8, 16], strides = [1, 1]} : vector<8x96xf32> to vector<8x16xf32>
    %73 = vector.shape_cast %72 : vector<8x16xf32> to vector<1x8x16xf32>
    %74 = arith.truncf %69 : vector<1x8x16xf32> to vector<1x8x16xbf16>
    %75 = arith.truncf %71 : vector<1x8x16xf32> to vector<1x8x16xbf16>
    "tpu.trace_start"() <{level = 10 : i32, message = "bqd,bkd->bqk"}> : () -> ()
    %cst_30 = arith.constant dense<0.000000e+00> : vector<1x8x8xf32>
    %76 = tpu.matmul %74, %75, %cst_30 {dimension_numbers = #tpu.dot_dimension_numbers<[2], [2], [1], [1], [0, 0, 0, 1, 1, 1], [0], [0]>} : vector<1x8x16xbf16>, vector<1x8x16xbf16>, vector<1x8x8xf32> -> vector<1x8x8xf32>
    "tpu.trace_stop"() : () -> ()
    %cst_31 = arith.constant dense<0xFF800000> : vector<1x8xf32>
    %77 = vector.multi_reduction <maximumf>, %76, %cst_31 [2] : vector<1x8x8xf32> to vector<1x8xf32>
    %78 = vector.shape_cast %77 : vector<1x8xf32> to vector<1x8x1xf32>
    %79 = vector.broadcast %78 : vector<1x8x1xf32> to vector<1x8x8xf32>
    %80 = arith.subf %76, %79 : vector<1x8x8xf32>
    %81 = math.exp %80 : vector<1x8x8xf32>
    %cst_32 = arith.constant dense<0.000000e+00> : vector<1x8xf32>
    %82 = vector.multi_reduction <add>, %81, %cst_32 [2] : vector<1x8x8xf32> to vector<1x8xf32>
    %83 = vector.shape_cast %82 : vector<1x8xf32> to vector<1x8x1xf32>
    %84 = vector.broadcast %83 : vector<1x8x1xf32> to vector<1x8x8xf32>
    %85 = arith.divf %81, %84 : vector<1x8x8xf32>
    %86 = arith.truncf %85 : vector<1x8x8xf32> to vector<1x8x8xbf16>
    %87 = arith.truncf %73 : vector<1x8x16xf32> to vector<1x8x16xbf16>
    "tpu.trace_start"() <{level = 10 : i32, message = "bqk,bkd->bqd"}> : () -> ()
    %cst_33 = arith.constant dense<0.000000e+00> : vector<1x8x16xf32>
    %88 = tpu.matmul %86, %87, %cst_33 {dimension_numbers = #tpu.dot_dimension_numbers<[2], [1], [1], [2], [0, 0, 0, 1, 1, 2], [0], [0]>} : vector<1x8x8xbf16>, vector<1x8x16xbf16>, vector<1x8x16xf32> -> vector<1x8x16xf32>
    "tpu.trace_stop"() : () -> ()
    %89 = vector.shape_cast %88 : vector<1x8x16xf32> to vector<8x16xf32>
    %90 = arith.truncf %89 : vector<8x16xf32> to vector<8x16xbf16>
    %91 = vector.extract_strided_slice %37 {offsets = [1, 0, 0], sizes = [1, 16, 32], strides = [1, 1, 1]} : vector<2x16x32xbf16> to vector<1x16x32xbf16>
    %92 = vector.shape_cast %91 : vector<1x16x32xbf16> to vector<16x32xbf16>
    %cst_34 = arith.constant dense<0.000000e+00> : vector<8x32xf32>
    %93 = tpu.matmul %90, %92, %cst_34 {dimension_numbers = #tpu.dot_dimension_numbers<[1], [0], [0], [1], [0, 0, 1, 1], [], []>} : vector<8x16xbf16>, vector<16x32xbf16>, vector<8x32xf32> -> vector<8x32xf32>
    %94 = arith.addf %67, %93 : vector<8x32xf32>
    %95 = arith.addf %94, %27 : vector<8x32xf32>
    %c0_35 = arith.constant 0 : index
    %c0_36 = arith.constant 0 : index
    %c0_37 = arith.constant 0 : index
    %96 = vector.load %arg8[%c0_35, %c0_36, %c0_37] : memref<2x1x32xf32, #tpu.memory_space<vmem>>, vector<1x1x32xf32>
    %97 = vector.shape_cast %96 : vector<1x1x32xf32> to vector<1x32xf32>
    %c0_38 = arith.constant 0 : index
    %c0_39 = arith.constant 0 : index
    %c0_40 = arith.constant 0 : index
    %98 = vector.load %arg9[%c0_38, %c0_39, %c0_40] : memref<2x1x32xf32, #tpu.memory_space<vmem>>, vector<1x1x32xf32>
    %99 = vector.shape_cast %98 : vector<1x1x32xf32> to vector<1x32xf32>
    %cst_41 = arith.constant dense<0.000000e+00> : vector<8xf32>
    %100 = vector.multi_reduction <add>, %95, %cst_41 [1] : vector<8x32xf32> to vector<8xf32>
    %101 = vector.shape_cast %100 : vector<8xf32> to vector<8x1xf32>
    %cst_42 = arith.constant 3.200000e+01 : f32
    %102 = vector.broadcast %cst_42 : f32 to vector<8x1xf32>
    %103 = arith.divf %101, %102 : vector<8x1xf32>
    %104 = arith.mulf %95, %95 : vector<8x32xf32>
    %cst_43 = arith.constant dense<0.000000e+00> : vector<8xf32>
    %105 = vector.multi_reduction <add>, %104, %cst_43 [1] : vector<8x32xf32> to vector<8xf32>
    %106 = vector.shape_cast %105 : vector<8xf32> to vector<8x1xf32>
    %cst_44 = arith.constant 3.200000e+01 : f32
    %107 = vector.broadcast %cst_44 : f32 to vector<8x1xf32>
    %108 = arith.divf %106, %107 : vector<8x1xf32>
    %109 = arith.mulf %103, %103 : vector<8x1xf32>
    %110 = arith.subf %108, %109 : vector<8x1xf32>
    %cst_45 = arith.constant 0.000000e+00 : f32
    %111 = vector.broadcast %cst_45 : f32 to vector<8x1xf32>
    %112 = arith.maximumf %110, %111 : vector<8x1xf32>
    %113 = vector.broadcast %103 : vector<8x1xf32> to vector<8x32xf32>
    %114 = arith.subf %95, %113 : vector<8x32xf32>
    %cst_46 = arith.constant 9.99999996E-13 : f32
    %115 = vector.broadcast %cst_46 : f32 to vector<8x1xf32>
    %116 = arith.addf %112, %115 : vector<8x1xf32>
    %117 = math.rsqrt %116 : vector<8x1xf32>
    %118 = vector.broadcast %117 : vector<8x1xf32> to vector<8x32xf32>
    %119 = arith.mulf %114, %118 : vector<8x32xf32>
    %120 = vector.broadcast %97 : vector<1x32xf32> to vector<8x32xf32>
    %121 = arith.mulf %119, %120 : vector<8x32xf32>
    %122 = vector.broadcast %99 : vector<1x32xf32> to vector<8x32xf32>
    %123 = arith.addf %121, %122 : vector<8x32xf32>
    %124 = arith.truncf %123 : vector<8x32xf32> to vector<8x32xbf16>
    %c0_47 = arith.constant 0 : index
    %c0_48 = arith.constant 0 : index
    %c0_49 = arith.constant 0 : index
    %125 = vector.load %arg10[%c0_47, %c0_48, %c0_49] : memref<2x32x64xbf16, #tpu.memory_space<vmem>>, vector<1x32x64xbf16>
    %126 = vector.shape_cast %125 : vector<1x32x64xbf16> to vector<32x64xbf16>
    %cst_50 = arith.constant dense<0.000000e+00> : vector<8x64xf32>
    %127 = tpu.matmul %124, %126, %cst_50 {dimension_numbers = #tpu.dot_dimension_numbers<[1], [0], [0], [1], [0, 0, 1, 1], [], []>} : vector<8x32xbf16>, vector<32x64xbf16>, vector<8x64xf32> -> vector<8x64xf32>
    %c0_51 = arith.constant 0 : index
    %c0_52 = arith.constant 0 : index
    %c0_53 = arith.constant 0 : index
    %128 = vector.load %arg11[%c0_51, %c0_52, %c0_53] : memref<2x1x64xf32, #tpu.memory_space<vmem>>, vector<1x1x64xf32>
    %129 = vector.shape_cast %128 : vector<1x1x64xf32> to vector<1x64xf32>
    %130 = vector.broadcast %129 : vector<1x64xf32> to vector<8x64xf32>
    %131 = arith.addf %127, %130 : vector<8x64xf32>
    %132 = arith.mulf %131, %131 : vector<8x64xf32>
    %133 = arith.mulf %131, %132 : vector<8x64xf32>
    %cst_54 = arith.constant 4.471500e-02 : f32
    %134 = vector.broadcast %cst_54 : f32 to vector<8x64xf32>
    %135 = arith.mulf %134, %133 : vector<8x64xf32>
    %136 = arith.addf %131, %135 : vector<8x64xf32>
    %cst_55 = arith.constant 0.797884583 : f32
    %137 = vector.broadcast %cst_55 : f32 to vector<8x64xf32>
    %138 = arith.mulf %137, %136 : vector<8x64xf32>
    %139 = math.tanh %138 : vector<8x64xf32>
    %cst_56 = arith.constant 1.000000e+00 : f32
    %140 = vector.broadcast %cst_56 : f32 to vector<8x64xf32>
    %141 = arith.addf %140, %139 : vector<8x64xf32>
    %cst_57 = arith.constant 5.000000e-01 : f32
    %142 = vector.broadcast %cst_57 : f32 to vector<8x64xf32>
    %143 = arith.mulf %142, %141 : vector<8x64xf32>
    %144 = arith.mulf %131, %143 : vector<8x64xf32>
    %145 = arith.truncf %144 : vector<8x64xf32> to vector<8x64xbf16>
    %c0_58 = arith.constant 0 : index
    %c0_59 = arith.constant 0 : index
    %c0_60 = arith.constant 0 : index
    %146 = vector.load %arg12[%c0_58, %c0_59, %c0_60] : memref<2x64x32xbf16, #tpu.memory_space<vmem>>, vector<1x64x32xbf16>
    %147 = vector.shape_cast %146 : vector<1x64x32xbf16> to vector<64x32xbf16>
    %cst_61 = arith.constant dense<0.000000e+00> : vector<8x32xf32>
    %148 = tpu.matmul %145, %147, %cst_61 {dimension_numbers = #tpu.dot_dimension_numbers<[1], [0], [0], [1], [0, 0, 1, 1], [], []>} : vector<8x64xbf16>, vector<64x32xbf16>, vector<8x32xf32> -> vector<8x32xf32>
    %c0_62 = arith.constant 0 : index
    %c0_63 = arith.constant 0 : index
    %c0_64 = arith.constant 0 : index
    %149 = vector.load %arg13[%c0_62, %c0_63, %c0_64] : memref<2x1x32xf32, #tpu.memory_space<vmem>>, vector<1x1x32xf32>
    %150 = vector.shape_cast %149 : vector<1x1x32xf32> to vector<1x32xf32>
    %151 = vector.broadcast %150 : vector<1x32xf32> to vector<8x32xf32>
    %152 = arith.addf %148, %151 : vector<8x32xf32>
    %153 = arith.addf %152, %123 : vector<8x32xf32>
    %c0_65 = arith.constant 0 : index
    %c0_66 = arith.constant 0 : index
    %c0_67 = arith.constant 0 : index
    %154 = vector.load %arg14[%c0_65, %c0_66, %c0_67] : memref<2x1x32xf32, #tpu.memory_space<vmem>>, vector<1x1x32xf32>
    %155 = vector.shape_cast %154 : vector<1x1x32xf32> to vector<1x32xf32>
    %c0_68 = arith.constant 0 : index
    %c0_69 = arith.constant 0 : index
    %c0_70 = arith.constant 0 : index
    %156 = vector.load %arg15[%c0_68, %c0_69, %c0_70] : memref<2x1x32xf32, #tpu.memory_space<vmem>>, vector<1x1x32xf32>
    %157 = vector.shape_cast %156 : vector<1x1x32xf32> to vector<1x32xf32>
    %cst_71 = arith.constant dense<0.000000e+00> : vector<8xf32>
    %158 = vector.multi_reduction <add>, %153, %cst_71 [1] : vector<8x32xf32> to vector<8xf32>
    %159 = vector.shape_cast %158 : vector<8xf32> to vector<8x1xf32>
    %cst_72 = arith.constant 3.200000e+01 : f32
    %160 = vector.broadcast %cst_72 : f32 to vector<8x1xf32>
    %161 = arith.divf %159, %160 : vector<8x1xf32>
    %162 = arith.mulf %153, %153 : vector<8x32xf32>
    %cst_73 = arith.constant dense<0.000000e+00> : vector<8xf32>
    %163 = vector.multi_reduction <add>, %162, %cst_73 [1] : vector<8x32xf32> to vector<8xf32>
    %164 = vector.shape_cast %163 : vector<8xf32> to vector<8x1xf32>
    %cst_74 = arith.constant 3.200000e+01 : f32
    %165 = vector.broadcast %cst_74 : f32 to vector<8x1xf32>
    %166 = arith.divf %164, %165 : vector<8x1xf32>
    %167 = arith.mulf %161, %161 : vector<8x1xf32>
    %168 = arith.subf %166, %167 : vector<8x1xf32>
    %cst_75 = arith.constant 0.000000e+00 : f32
    %169 = vector.broadcast %cst_75 : f32 to vector<8x1xf32>
    %170 = arith.maximumf %168, %169 : vector<8x1xf32>
    %171 = vector.broadcast %161 : vector<8x1xf32> to vector<8x32xf32>
    %172 = arith.subf %153, %171 : vector<8x32xf32>
    %cst_76 = arith.constant 9.99999996E-13 : f32
    %173 = vector.broadcast %cst_76 : f32 to vector<8x1xf32>
    %174 = arith.addf %170, %173 : vector<8x1xf32>
    %175 = math.rsqrt %174 : vector<8x1xf32>
    %176 = vector.broadcast %175 : vector<8x1xf32> to vector<8x32xf32>
    %177 = arith.mulf %172, %176 : vector<8x32xf32>
    %178 = vector.broadcast %155 : vector<1x32xf32> to vector<8x32xf32>
    %179 = arith.mulf %177, %178 : vector<8x32xf32>
    %180 = vector.broadcast %157 : vector<1x32xf32> to vector<8x32xf32>
    %181 = arith.addf %179, %180 : vector<8x32xf32>
    %182 = vector.shape_cast %181 : vector<8x32xf32> to vector<1x8x32xf32>
    %cst_77 = arith.constant dense<0.000000e+00> : vector<1x32xf32>
    %183 = vector.multi_reduction <add>, %182, %cst_77 [1] : vector<1x8x32xf32> to vector<1x32xf32>
    %cst_78 = arith.constant 8.000000e+00 : f32
    %184 = vector.broadcast %cst_78 : f32 to vector<1x32xf32>
    %185 = arith.divf %183, %184 : vector<1x32xf32>
    %186 = arith.truncf %181 : vector<8x32xf32> to vector<8x32xbf16>
    %c1 = arith.constant 1 : index
    %c0_79 = arith.constant 0 : index
    %c0_80 = arith.constant 0 : index
    %187 = vector.load %arg4[%c1, %c0_79, %c0_80] : memref<2x32x96xbf16, #tpu.memory_space<vmem>>, vector<1x32x96xbf16>
    %188 = vector.shape_cast %187 : vector<1x32x96xbf16> to vector<32x96xbf16>
    %cst_81 = arith.constant dense<0.000000e+00> : vector<8x96xf32>
    %189 = tpu.matmul %186, %188, %cst_81 {dimension_numbers = #tpu.dot_dimension_numbers<[1], [0], [0], [1], [0, 0, 1, 1], [], []>} : vector<8x32xbf16>, vector<32x96xbf16>, vector<8x96xf32> -> vector<8x96xf32>
    %c1_82 = arith.constant 1 : index
    %c0_83 = arith.constant 0 : index
    %c0_84 = arith.constant 0 : index
    %190 = vector.load %arg5[%c1_82, %c0_83, %c0_84] : memref<2x1x96xf32, #tpu.memory_space<vmem>>, vector<1x1x96xf32>
    %191 = vector.shape_cast %190 : vector<1x1x96xf32> to vector<1x96xf32>
    %192 = vector.broadcast %191 : vector<1x96xf32> to vector<8x96xf32>
    %193 = arith.addf %189, %192 : vector<8x96xf32>
    %c1_85 = arith.constant 1 : index
    %c0_86 = arith.constant 0 : index
    %c0_87 = arith.constant 0 : index
    %c0_88 = arith.constant 0 : index
    %194 = vector.load %arg6[%c1_85, %c0_86, %c0_87, %c0_88] : memref<2x2x16x32xbf16, #tpu.memory_space<vmem>>, vector<1x2x16x32xbf16>
    %195 = vector.shape_cast %194 : vector<1x2x16x32xbf16> to vector<2x16x32xbf16>
    %c1_89 = arith.constant 1 : index
    %c0_90 = arith.constant 0 : index
    %c0_91 = arith.constant 0 : index
    %196 = vector.load %arg7[%c1_89, %c0_90, %c0_91] : memref<2x1x32xf32, #tpu.memory_space<vmem>>, vector<1x1x32xf32>
    %197 = vector.shape_cast %196 : vector<1x1x32xf32> to vector<1x32xf32>
    %198 = vector.extract_strided_slice %193 {offsets = [0, 0], sizes = [8, 16], strides = [1, 1]} : vector<8x96xf32> to vector<8x16xf32>
    %199 = vector.shape_cast %198 : vector<8x16xf32> to vector<1x8x16xf32>
    %200 = vector.extract_strided_slice %193 {offsets = [0, 32], sizes = [8, 16], strides = [1, 1]} : vector<8x96xf32> to vector<8x16xf32>
    %201 = vector.shape_cast %200 : vector<8x16xf32> to vector<1x8x16xf32>
    %202 = vector.extract_strided_slice %193 {offsets = [0, 64], sizes = [8, 16], strides = [1, 1]} : vector<8x96xf32> to vector<8x16xf32>
    %203 = vector.shape_cast %202 : vector<8x16xf32> to vector<1x8x16xf32>
    %204 = arith.truncf %199 : vector<1x8x16xf32> to vector<1x8x16xbf16>
    %205 = arith.truncf %201 : vector<1x8x16xf32> to vector<1x8x16xbf16>
    "tpu.trace_start"() <{level = 10 : i32, message = "bqd,bkd->bqk"}> : () -> ()
    %cst_92 = arith.constant dense<0.000000e+00> : vector<1x8x8xf32>
    %206 = tpu.matmul %204, %205, %cst_92 {dimension_numbers = #tpu.dot_dimension_numbers<[2], [2], [1], [1], [0, 0, 0, 1, 1, 1], [0], [0]>} : vector<1x8x16xbf16>, vector<1x8x16xbf16>, vector<1x8x8xf32> -> vector<1x8x8xf32>
    "tpu.trace_stop"() : () -> ()
    %cst_93 = arith.constant dense<0xFF800000> : vector<1x8xf32>
    %207 = vector.multi_reduction <maximumf>, %206, %cst_93 [2] : vector<1x8x8xf32> to vector<1x8xf32>
    %208 = vector.shape_cast %207 : vector<1x8xf32> to vector<1x8x1xf32>
    %209 = vector.broadcast %208 : vector<1x8x1xf32> to vector<1x8x8xf32>
    %210 = arith.subf %206, %209 : vector<1x8x8xf32>
    %211 = math.exp %210 : vector<1x8x8xf32>
    %cst_94 = arith.constant dense<0.000000e+00> : vector<1x8xf32>
    %212 = vector.multi_reduction <add>, %211, %cst_94 [2] : vector<1x8x8xf32> to vector<1x8xf32>
    %213 = vector.shape_cast %212 : vector<1x8xf32> to vector<1x8x1xf32>
    %214 = vector.broadcast %213 : vector<1x8x1xf32> to vector<1x8x8xf32>
    %215 = arith.divf %211, %214 : vector<1x8x8xf32>
    %216 = arith.truncf %215 : vector<1x8x8xf32> to vector<1x8x8xbf16>
    %217 = arith.truncf %203 : vector<1x8x16xf32> to vector<1x8x16xbf16>
    "tpu.trace_start"() <{level = 10 : i32, message = "bqk,bkd->bqd"}> : () -> ()
    %cst_95 = arith.constant dense<0.000000e+00> : vector<1x8x16xf32>
    %218 = tpu.matmul %216, %217, %cst_95 {dimension_numbers = #tpu.dot_dimension_numbers<[2], [1], [1], [2], [0, 0, 0, 1, 1, 2], [0], [0]>} : vector<1x8x8xbf16>, vector<1x8x16xbf16>, vector<1x8x16xf32> -> vector<1x8x16xf32>
    "tpu.trace_stop"() : () -> ()
    %219 = vector.shape_cast %218 : vector<1x8x16xf32> to vector<8x16xf32>
    %220 = arith.truncf %219 : vector<8x16xf32> to vector<8x16xbf16>
    %221 = vector.extract_strided_slice %195 {offsets = [0, 0, 0], sizes = [1, 16, 32], strides = [1, 1, 1]} : vector<2x16x32xbf16> to vector<1x16x32xbf16>
    %222 = vector.shape_cast %221 : vector<1x16x32xbf16> to vector<16x32xbf16>
    %cst_96 = arith.constant dense<0.000000e+00> : vector<8x32xf32>
    %223 = tpu.matmul %220, %222, %cst_96 {dimension_numbers = #tpu.dot_dimension_numbers<[1], [0], [0], [1], [0, 0, 1, 1], [], []>} : vector<8x16xbf16>, vector<16x32xbf16>, vector<8x32xf32> -> vector<8x32xf32>
    %224 = vector.broadcast %197 : vector<1x32xf32> to vector<8x32xf32>
    %225 = arith.addf %224, %223 : vector<8x32xf32>
    %226 = vector.extract_strided_slice %193 {offsets = [0, 16], sizes = [8, 16], strides = [1, 1]} : vector<8x96xf32> to vector<8x16xf32>
    %227 = vector.shape_cast %226 : vector<8x16xf32> to vector<1x8x16xf32>
    %228 = vector.extract_strided_slice %193 {offsets = [0, 48], sizes = [8, 16], strides = [1, 1]} : vector<8x96xf32> to vector<8x16xf32>
    %229 = vector.shape_cast %228 : vector<8x16xf32> to vector<1x8x16xf32>
    %230 = vector.extract_strided_slice %193 {offsets = [0, 80], sizes = [8, 16], strides = [1, 1]} : vector<8x96xf32> to vector<8x16xf32>
    %231 = vector.shape_cast %230 : vector<8x16xf32> to vector<1x8x16xf32>
    %232 = arith.truncf %227 : vector<1x8x16xf32> to vector<1x8x16xbf16>
    %233 = arith.truncf %229 : vector<1x8x16xf32> to vector<1x8x16xbf16>
    "tpu.trace_start"() <{level = 10 : i32, message = "bqd,bkd->bqk"}> : () -> ()
    %cst_97 = arith.constant dense<0.000000e+00> : vector<1x8x8xf32>
    %234 = tpu.matmul %232, %233, %cst_97 {dimension_numbers = #tpu.dot_dimension_numbers<[2], [2], [1], [1], [0, 0, 0, 1, 1, 1], [0], [0]>} : vector<1x8x16xbf16>, vector<1x8x16xbf16>, vector<1x8x8xf32> -> vector<1x8x8xf32>
    "tpu.trace_stop"() : () -> ()
    %cst_98 = arith.constant dense<0xFF800000> : vector<1x8xf32>
    %235 = vector.multi_reduction <maximumf>, %234, %cst_98 [2] : vector<1x8x8xf32> to vector<1x8xf32>
    %236 = vector.shape_cast %235 : vector<1x8xf32> to vector<1x8x1xf32>
    %237 = vector.broadcast %236 : vector<1x8x1xf32> to vector<1x8x8xf32>
    %238 = arith.subf %234, %237 : vector<1x8x8xf32>
    %239 = math.exp %238 : vector<1x8x8xf32>
    %cst_99 = arith.constant dense<0.000000e+00> : vector<1x8xf32>
    %240 = vector.multi_reduction <add>, %239, %cst_99 [2] : vector<1x8x8xf32> to vector<1x8xf32>
    %241 = vector.shape_cast %240 : vector<1x8xf32> to vector<1x8x1xf32>
    %242 = vector.broadcast %241 : vector<1x8x1xf32> to vector<1x8x8xf32>
    %243 = arith.divf %239, %242 : vector<1x8x8xf32>
    %244 = arith.truncf %243 : vector<1x8x8xf32> to vector<1x8x8xbf16>
    %245 = arith.truncf %231 : vector<1x8x16xf32> to vector<1x8x16xbf16>
    "tpu.trace_start"() <{level = 10 : i32, message = "bqk,bkd->bqd"}> : () -> ()
    %cst_100 = arith.constant dense<0.000000e+00> : vector<1x8x16xf32>
    %246 = tpu.matmul %244, %245, %cst_100 {dimension_numbers = #tpu.dot_dimension_numbers<[2], [1], [1], [2], [0, 0, 0, 1, 1, 2], [0], [0]>} : vector<1x8x8xbf16>, vector<1x8x16xbf16>, vector<1x8x16xf32> -> vector<1x8x16xf32>
    "tpu.trace_stop"() : () -> ()
    %247 = vector.shape_cast %246 : vector<1x8x16xf32> to vector<8x16xf32>
    %248 = arith.truncf %247 : vector<8x16xf32> to vector<8x16xbf16>
    %249 = vector.extract_strided_slice %195 {offsets = [1, 0, 0], sizes = [1, 16, 32], strides = [1, 1, 1]} : vector<2x16x32xbf16> to vector<1x16x32xbf16>
    %250 = vector.shape_cast %249 : vector<1x16x32xbf16> to vector<16x32xbf16>
    %cst_101 = arith.constant dense<0.000000e+00> : vector<8x32xf32>
    %251 = tpu.matmul %248, %250, %cst_101 {dimension_numbers = #tpu.dot_dimension_numbers<[1], [0], [0], [1], [0, 0, 1, 1], [], []>} : vector<8x16xbf16>, vector<16x32xbf16>, vector<8x32xf32> -> vector<8x32xf32>
    %252 = arith.addf %225, %251 : vector<8x32xf32>
    %253 = arith.addf %252, %181 : vector<8x32xf32>
    %c1_102 = arith.constant 1 : index
    %c0_103 = arith.constant 0 : index
    %c0_104 = arith.constant 0 : index
    %254 = vector.load %arg8[%c1_102, %c0_103, %c0_104] : memref<2x1x32xf32, #tpu.memory_space<vmem>>, vector<1x1x32xf32>
    %255 = vector.shape_cast %254 : vector<1x1x32xf32> to vector<1x32xf32>
    %c1_105 = arith.constant 1 : index
    %c0_106 = arith.constant 0 : index
    %c0_107 = arith.constant 0 : index
    %256 = vector.load %arg9[%c1_105, %c0_106, %c0_107] : memref<2x1x32xf32, #tpu.memory_space<vmem>>, vector<1x1x32xf32>
    %257 = vector.shape_cast %256 : vector<1x1x32xf32> to vector<1x32xf32>
    %cst_108 = arith.constant dense<0.000000e+00> : vector<8xf32>
    %258 = vector.multi_reduction <add>, %253, %cst_108 [1] : vector<8x32xf32> to vector<8xf32>
    %259 = vector.shape_cast %258 : vector<8xf32> to vector<8x1xf32>
    %cst_109 = arith.constant 3.200000e+01 : f32
    %260 = vector.broadcast %cst_109 : f32 to vector<8x1xf32>
    %261 = arith.divf %259, %260 : vector<8x1xf32>
    %262 = arith.mulf %253, %253 : vector<8x32xf32>
    %cst_110 = arith.constant dense<0.000000e+00> : vector<8xf32>
    %263 = vector.multi_reduction <add>, %262, %cst_110 [1] : vector<8x32xf32> to vector<8xf32>
    %264 = vector.shape_cast %263 : vector<8xf32> to vector<8x1xf32>
    %cst_111 = arith.constant 3.200000e+01 : f32
    %265 = vector.broadcast %cst_111 : f32 to vector<8x1xf32>
    %266 = arith.divf %264, %265 : vector<8x1xf32>
    %267 = arith.mulf %261, %261 : vector<8x1xf32>
    %268 = arith.subf %266, %267 : vector<8x1xf32>
    %cst_112 = arith.constant 0.000000e+00 : f32
    %269 = vector.broadcast %cst_112 : f32 to vector<8x1xf32>
    %270 = arith.maximumf %268, %269 : vector<8x1xf32>
    %271 = vector.broadcast %261 : vector<8x1xf32> to vector<8x32xf32>
    %272 = arith.subf %253, %271 : vector<8x32xf32>
    %cst_113 = arith.constant 9.99999996E-13 : f32
    %273 = vector.broadcast %cst_113 : f32 to vector<8x1xf32>
    %274 = arith.addf %270, %273 : vector<8x1xf32>
    %275 = math.rsqrt %274 : vector<8x1xf32>
    %276 = vector.broadcast %275 : vector<8x1xf32> to vector<8x32xf32>
    %277 = arith.mulf %272, %276 : vector<8x32xf32>
    %278 = vector.broadcast %255 : vector<1x32xf32> to vector<8x32xf32>
    %279 = arith.mulf %277, %278 : vector<8x32xf32>
    %280 = vector.broadcast %257 : vector<1x32xf32> to vector<8x32xf32>
    %281 = arith.addf %279, %280 : vector<8x32xf32>
    %282 = arith.truncf %281 : vector<8x32xf32> to vector<8x32xbf16>
    %c1_114 = arith.constant 1 : index
    %c0_115 = arith.constant 0 : index
    %c0_116 = arith.constant 0 : index
    %283 = vector.load %arg10[%c1_114, %c0_115, %c0_116] : memref<2x32x64xbf16, #tpu.memory_space<vmem>>, vector<1x32x64xbf16>
    %284 = vector.shape_cast %283 : vector<1x32x64xbf16> to vector<32x64xbf16>
    %cst_117 = arith.constant dense<0.000000e+00> : vector<8x64xf32>
    %285 = tpu.matmul %282, %284, %cst_117 {dimension_numbers = #tpu.dot_dimension_numbers<[1], [0], [0], [1], [0, 0, 1, 1], [], []>} : vector<8x32xbf16>, vector<32x64xbf16>, vector<8x64xf32> -> vector<8x64xf32>
    %c1_118 = arith.constant 1 : index
    %c0_119 = arith.constant 0 : index
    %c0_120 = arith.constant 0 : index
    %286 = vector.load %arg11[%c1_118, %c0_119, %c0_120] : memref<2x1x64xf32, #tpu.memory_space<vmem>>, vector<1x1x64xf32>
    %287 = vector.shape_cast %286 : vector<1x1x64xf32> to vector<1x64xf32>
    %288 = vector.broadcast %287 : vector<1x64xf32> to vector<8x64xf32>
    %289 = arith.addf %285, %288 : vector<8x64xf32>
    %290 = arith.mulf %289, %289 : vector<8x64xf32>
    %291 = arith.mulf %289, %290 : vector<8x64xf32>
    %cst_121 = arith.constant 4.471500e-02 : f32
    %292 = vector.broadcast %cst_121 : f32 to vector<8x64xf32>
    %293 = arith.mulf %292, %291 : vector<8x64xf32>
    %294 = arith.addf %289, %293 : vector<8x64xf32>
    %cst_122 = arith.constant 0.797884583 : f32
    %295 = vector.broadcast %cst_122 : f32 to vector<8x64xf32>
    %296 = arith.mulf %295, %294 : vector<8x64xf32>
    %297 = math.tanh %296 : vector<8x64xf32>
    %cst_123 = arith.constant 1.000000e+00 : f32
    %298 = vector.broadcast %cst_123 : f32 to vector<8x64xf32>
    %299 = arith.addf %298, %297 : vector<8x64xf32>
    %cst_124 = arith.constant 5.000000e-01 : f32
    %300 = vector.broadcast %cst_124 : f32 to vector<8x64xf32>
    %301 = arith.mulf %300, %299 : vector<8x64xf32>
    %302 = arith.mulf %289, %301 : vector<8x64xf32>
    %303 = arith.truncf %302 : vector<8x64xf32> to vector<8x64xbf16>
    %c1_125 = arith.constant 1 : index
    %c0_126 = arith.constant 0 : index
    %c0_127 = arith.constant 0 : index
    %304 = vector.load %arg12[%c1_125, %c0_126, %c0_127] : memref<2x64x32xbf16, #tpu.memory_space<vmem>>, vector<1x64x32xbf16>
    %305 = vector.shape_cast %304 : vector<1x64x32xbf16> to vector<64x32xbf16>
    %cst_128 = arith.constant dense<0.000000e+00> : vector<8x32xf32>
    %306 = tpu.matmul %303, %305, %cst_128 {dimension_numbers = #tpu.dot_dimension_numbers<[1], [0], [0], [1], [0, 0, 1, 1], [], []>} : vector<8x64xbf16>, vector<64x32xbf16>, vector<8x32xf32> -> vector<8x32xf32>
    %c1_129 = arith.constant 1 : index
    %c0_130 = arith.constant 0 : index
    %c0_131 = arith.constant 0 : index
    %307 = vector.load %arg13[%c1_129, %c0_130, %c0_131] : memref<2x1x32xf32, #tpu.memory_space<vmem>>, vector<1x1x32xf32>
    %308 = vector.shape_cast %307 : vector<1x1x32xf32> to vector<1x32xf32>
    %309 = vector.broadcast %308 : vector<1x32xf32> to vector<8x32xf32>
    %310 = arith.addf %306, %309 : vector<8x32xf32>
    %311 = arith.addf %310, %281 : vector<8x32xf32>
    %c1_132 = arith.constant 1 : index
    %c0_133 = arith.constant 0 : index
    %c0_134 = arith.constant 0 : index
    %312 = vector.load %arg14[%c1_132, %c0_133, %c0_134] : memref<2x1x32xf32, #tpu.memory_space<vmem>>, vector<1x1x32xf32>
    %313 = vector.shape_cast %312 : vector<1x1x32xf32> to vector<1x32xf32>
    %c1_135 = arith.constant 1 : index
    %c0_136 = arith.constant 0 : index
    %c0_137 = arith.constant 0 : index
    %314 = vector.load %arg15[%c1_135, %c0_136, %c0_137] : memref<2x1x32xf32, #tpu.memory_space<vmem>>, vector<1x1x32xf32>
    %315 = vector.shape_cast %314 : vector<1x1x32xf32> to vector<1x32xf32>
    %cst_138 = arith.constant dense<0.000000e+00> : vector<8xf32>
    %316 = vector.multi_reduction <add>, %311, %cst_138 [1] : vector<8x32xf32> to vector<8xf32>
    %317 = vector.shape_cast %316 : vector<8xf32> to vector<8x1xf32>
    %cst_139 = arith.constant 3.200000e+01 : f32
    %318 = vector.broadcast %cst_139 : f32 to vector<8x1xf32>
    %319 = arith.divf %317, %318 : vector<8x1xf32>
    %320 = arith.mulf %311, %311 : vector<8x32xf32>
    %cst_140 = arith.constant dense<0.000000e+00> : vector<8xf32>
    %321 = vector.multi_reduction <add>, %320, %cst_140 [1] : vector<8x32xf32> to vector<8xf32>
    %322 = vector.shape_cast %321 : vector<8xf32> to vector<8x1xf32>
    %cst_141 = arith.constant 3.200000e+01 : f32
    %323 = vector.broadcast %cst_141 : f32 to vector<8x1xf32>
    %324 = arith.divf %322, %323 : vector<8x1xf32>
    %325 = arith.mulf %319, %319 : vector<8x1xf32>
    %326 = arith.subf %324, %325 : vector<8x1xf32>
    %cst_142 = arith.constant 0.000000e+00 : f32
    %327 = vector.broadcast %cst_142 : f32 to vector<8x1xf32>
    %328 = arith.maximumf %326, %327 : vector<8x1xf32>
    %329 = vector.broadcast %319 : vector<8x1xf32> to vector<8x32xf32>
    %330 = arith.subf %311, %329 : vector<8x32xf32>
    %cst_143 = arith.constant 9.99999996E-13 : f32
    %331 = vector.broadcast %cst_143 : f32 to vector<8x1xf32>
    %332 = arith.addf %328, %331 : vector<8x1xf32>
    %333 = math.rsqrt %332 : vector<8x1xf32>
    %334 = vector.broadcast %333 : vector<8x1xf32> to vector<8x32xf32>
    %335 = arith.mulf %330, %334 : vector<8x32xf32>
    %336 = vector.broadcast %313 : vector<1x32xf32> to vector<8x32xf32>
    %337 = arith.mulf %335, %336 : vector<8x32xf32>
    %338 = vector.broadcast %315 : vector<1x32xf32> to vector<8x32xf32>
    %339 = arith.addf %337, %338 : vector<8x32xf32>
    %340 = vector.shape_cast %339 : vector<8x32xf32> to vector<1x8x32xf32>
    %cst_144 = arith.constant dense<0.000000e+00> : vector<1x32xf32>
    %341 = vector.multi_reduction <add>, %340, %cst_144 [1] : vector<1x8x32xf32> to vector<1x32xf32>
    %cst_145 = arith.constant 8.000000e+00 : f32
    %342 = vector.broadcast %cst_145 : f32 to vector<1x32xf32>
    %343 = arith.divf %341, %342 : vector<1x32xf32>
    %344 = vector.shape_cast %339 : vector<8x32xf32> to vector<1x8x32xf32>
    %345 = vector.extract_strided_slice %344 {offsets = [0, 0, 0], sizes = [1, 1, 32], strides = [1, 1, 1]} : vector<1x8x32xf32> to vector<1x1x32xf32>
    %346 = vector.shape_cast %345 : vector<1x1x32xf32> to vector<1x32xf32>
    %347 = tpu.concatenate %346, %185, %343, %343 in 1 : vector<1x32xf32>, vector<1x32xf32>, vector<1x32xf32>, vector<1x32xf32> -> vector<1x128xf32>
    %348 = vector.shape_cast %347 : vector<1x128xf32> to vector<1x1x128xf32>
    %c0_146 = arith.constant 0 : index
    %c0_147 = arith.constant 0 : index
    %c0_148 = arith.constant 0 : index
    %349 = vector.load %arg16[%c0_146, %c0_147, %c0_148] : memref<1x1x128xf32, #tpu.memory_space<vmem>>, vector<1x1x128xf32>
    tpu.vector_store %arg16[%c0_146, %c0_147, %c0_148], %348 {strides = array<i32>} : memref<1x1x128xf32, #tpu.memory_space<vmem>>, vector<1x1x128xf32>,
    return
  }
  func.func @transform_0(%arg0: i32) -> (i32, i32, i32) {
    %c0_i32 = arith.constant 0 : i32
    %c0_i32_0 = arith.constant 0 : i32
    %c0_i32_1 = arith.constant 0 : i32
    return %arg0, %c0_i32, %c0_i32_0 : i32, i32, i32
  }
  func.func @transform_1(%arg0: i32) -> (i32, i32) {
    %c0_i32 = arith.constant 0 : i32
    %c0_i32_0 = arith.constant 0 : i32
    %c0_i32_1 = arith.constant 0 : i32
    return %c0_i32, %c0_i32_0 : i32, i32
  }
  func.func @transform_2(%arg0: i32) -> (i32, i32) {
    %c0_i32 = arith.constant 0 : i32
    %c0_i32_0 = arith.constant 0 : i32
    %c0_i32_1 = arith.constant 0 : i32
    return %c0_i32, %c0_i32_0 : i32, i32
  }
  func.func @transform_3(%arg0: i32) -> (i32, i32, i32) {
    %c0_i32 = arith.constant 0 : i32
    %c0_i32_0 = arith.constant 0 : i32
    %c0_i32_1 = arith.constant 0 : i32
    %c0_i32_2 = arith.constant 0 : i32
    return %c0_i32, %c0_i32_0, %c0_i32_1 : i32, i32, i32
  }
  func.func @transform_4(%arg0: i32) -> (i32, i32, i32) {
    %c0_i32 = arith.constant 0 : i32
    %c0_i32_0 = arith.constant 0 : i32
    %c0_i32_1 = arith.constant 0 : i32
    %c0_i32_2 = arith.constant 0 : i32
    return %c0_i32, %c0_i32_0, %c0_i32_1 : i32, i32, i32
  }
  func.func @transform_5(%arg0: i32) -> (i32, i32, i32, i32) {
    %c0_i32 = arith.constant 0 : i32
    %c0_i32_0 = arith.constant 0 : i32
    %c0_i32_1 = arith.constant 0 : i32
    %c0_i32_2 = arith.constant 0 : i32
    %c0_i32_3 = arith.constant 0 : i32
    return %c0_i32, %c0_i32_0, %c0_i32_1, %c0_i32_2 : i32, i32, i32, i32
  }
  func.func @transform_6(%arg0: i32) -> (i32, i32, i32) {
    %c0_i32 = arith.constant 0 : i32
    %c0_i32_0 = arith.constant 0 : i32
    %c0_i32_1 = arith.constant 0 : i32
    %c0_i32_2 = arith.constant 0 : i32
    return %c0_i32, %c0_i32_0, %c0_i32_1 : i32, i32, i32
  }
  func.func @transform_7(%arg0: i32) -> (i32, i32, i32) {
    %c0_i32 = arith.constant 0 : i32
    %c0_i32_0 = arith.constant 0 : i32
    %c0_i32_1 = arith.constant 0 : i32
    %c0_i32_2 = arith.constant 0 : i32
    return %c0_i32, %c0_i32_0, %c0_i32_1 : i32, i32, i32
  }
  func.func @transform_8(%arg0: i32) -> (i32, i32, i32) {
    %c0_i32 = arith.constant 0 : i32
    %c0_i32_0 = arith.constant 0 : i32
    %c0_i32_1 = arith.constant 0 : i32
    %c0_i32_2 = arith.constant 0 : i32
    return %c0_i32, %c0_i32_0, %c0_i32_1 : i32, i32, i32
  }
  func.func @transform_9(%arg0: i32) -> (i32, i32, i32) {
    %c0_i32 = arith.constant 0 : i32
    %c0_i32_0 = arith.constant 0 : i32
    %c0_i32_1 = arith.constant 0 : i32
    %c0_i32_2 = arith.constant 0 : i32
    return %c0_i32, %c0_i32_0, %c0_i32_1 : i32, i32, i32
  }
  func.func @transform_10(%arg0: i32) -> (i32, i32, i32) {
    %c0_i32 = arith.constant 0 : i32
    %c0_i32_0 = arith.constant 0 : i32
    %c0_i32_1 = arith.constant 0 : i32
    %c0_i32_2 = arith.constant 0 : i32
    return %c0_i32, %c0_i32_0, %c0_i32_1 : i32, i32, i32
  }
  func.func @transform_11(%arg0: i32) -> (i32, i32, i32) {
    %c0_i32 = arith.constant 0 : i32
    %c0_i32_0 = arith.constant 0 : i32
    %c0_i32_1 = arith.constant 0 : i32
    %c0_i32_2 = arith.constant 0 : i32
    return %c0_i32, %c0_i32_0, %c0_i32_1 : i32, i32, i32
  }
  func.func @transform_12(%arg0: i32) -> (i32, i32, i32) {
    %c0_i32 = arith.constant 0 : i32
    %c0_i32_0 = arith.constant 0 : i32
    %c0_i32_1 = arith.constant 0 : i32
    %c0_i32_2 = arith.constant 0 : i32
    return %c0_i32, %c0_i32_0, %c0_i32_1 : i32, i32, i32
  }
  func.func @transform_13(%arg0: i32) -> (i32, i32, i32) {
    %c0_i32 = arith.constant 0 : i32
    %c0_i32_0 = arith.constant 0 : i32
    %c0_i32_1 = arith.constant 0 : i32
    %c0_i32_2 = arith.constant 0 : i32
    return %c0_i32, %c0_i32_0, %c0_i32_1 : i32, i32, i32
  }
  func.func @transform_14(%arg0: i32) -> (i32, i32, i32) {
    %c0_i32 = arith.constant 0 : i32
    %c0_i32_0 = arith.constant 0 : i32
    %c0_i32_1 = arith.constant 0 : i32
    %c0_i32_2 = arith.constant 0 : i32
    return %c0_i32, %c0_i32_0, %c0_i32_1 : i32, i32, i32
  }
  func.func @transform_15(%arg0: i32) -> (i32, i32, i32) {
    %c0_i32 = arith.constant 0 : i32
    %c0_i32_0 = arith.constant 0 : i32
    %c0_i32_1 = arith.constant 0 : i32
    return %arg0, %c0_i32, %c0_i32_0 : i32, i32, i32
  }
}

</mosaic_0001>

<bundles_post_ra>
// kernel: baseline_forward.1
= control target key start
LH: loop header
LB: loop body
LE: loop exit
PB: predicated region body
PF: predicated region fallthrough
CT: control target
= control target key end

     0   :  { %s2298_s18 = smov 0   ;;  %s2576_s0 = inlined_call_operand.vmem [shape: f32[2,8,32], index: 0, kind: input, shape index: {}]   ;;  %s2577_s1 = inlined_call_operand.vmem [shape: f32[1,32], index: 1, kind: input, shape index: {}]   ;;  %s2578_s2 = inlined_call_operand.vmem [shape: f32[1,32], index: 2, kind: input, shape index: {}]   ;;  %s2579_s3 = inlined_call_operand.vmem [shape: bf16[2,32,96], index: 3, kind: input, shape index: {}]   ;;  %s2580_s4 = inlined_call_operand.vmem [shape: f32[2,1,96], index: 4, kind: input, shape index: {}]   ;;  %s2581_s5 = inlined_call_operand.vmem [shape: bf16[2,2,16,32], index: 5, kind: input, shape index: {}]   ;;  %s2582_s6 = inlined_call_operand.vmem [shape: f32[2,1,32], index: 6, kind: input, shape index: {}]   ;;  %s2583_s7 = inlined_call_operand.vmem [shape: f32[2,1,32], index: 7, kind: input, shape index: {}]   ;;  %s2584_s8 = inlined_call_operand.vmem [shape: f32[2,1,32], index: 8, kind: input, shape index: {}]   ;;  %s2585_s9 = inlined_call_operand.vmem [shape: bf16[2,32,64], index: 9, kind: input, shape index: {}]   ;;  %s2586_s10 = inlined_call_operand.vmem [shape: f32[2,1,64], index: 10, kind: input, shape index: {}]   ;;  %s2587_s11 = inlined_call_operand.vmem [shape: bf16[2,64,32], index: 11, kind: input, shape index: {}]   ;;  %s2588_s12 = inlined_call_operand.vmem [shape: f32[2,1,32], index: 12, kind: input, shape index: {}]   ;;  %s2589_s13 = inlined_call_operand.vmem [shape: f32[2,1,32], index: 13, kind: input, shape index: {}]   ;;  %s2590_s14 = inlined_call_operand.vmem [shape: f32[2,1,32], index: 14, kind: input, shape index: {}]   ;;  %s2591_s15 = inlined_call_operand.vmem [shape: f32[2,1,128], index: 15, kind: output, shape index: {}]  }
   0x1 LB: > { %s1870_s19 = sadd.s32 4294967295, %s2208_s18   ;;  %p1874_p0 = scmp.ge.s32.totalorder %s2208_s18, 1  ;;  %s2208_s18 = sphi %s2298_s18, %s25_s18  }
   0x2   : > { %p436_p1 = scmp.lt.s32.totalorder %s2208_s18, 3 }
   0x4   : > { %p437_p2 = pnand %p1874_p0, %p436_p1 }
   0x5   : > { %p481_p3 = scmp.lt.s32.totalorder (!%p437_p2), %s1870_s19, 1  ;;  %vm492_vm0 = vcmask (!%p437_p2), 261120   ;;  %v2152_v4 = vld [vmem:[%s2579_s3] sm:$0xff] (!%p437_p2)   ;;  %v2210_v5 = vmov (!%p437_p2), 0.0   ;;  %vm2211_vm1 = vmmov (!%p437_p2), 0   ;;  %v2153_v6 = vld [vmem:[%s2579_s3 + $0x8] sm:$0xff] (!%p437_p2)  }
   0x6   : > { %440 = sbr.rel (%p437_p2) target bundleno = 5601 (0x15e1), region = 80  ;;  %2008 = vmatprep.subr.bf16.mxu1 (!%p437_p2), %v2210_v5  ;;  %2012 = vmatprep.mubr.msk.bf16.mxu1 (!%p437_p2), %vm2211_vm1, %v2210_v5  ;;  %v1876_v17 = vld [vmem:[%s2577_s1] ss:$0 sm:$0xff] (!%p437_p2)  ;;  %s2212_s21 = smov (!%p437_p2), 64   ;;  %vm600_vm2 = vcmask (!%p437_p2), 130048   ;;  %vm665_vm3 = vcmask (!%p437_p2), 1043456  }
   0x7   : > { %2009 = vmatpush3.bf16.msra.mxu1 (!%p437_p2), %v2152_v4  ;;  %2022 = vmatprep.subr.bf16.mxu0 (!%p437_p2), %v2210_v5  ;;  %v1877_v19 = vld [vmem:[%s2578_s2] ss:$0 sm:$0xff] (!%p437_p2)  ;;  %s2213_s22 = smov (!%p437_p2), 96   ;;  %vm647_vm4 = vcmask (!%p437_p2), 64512   ;;  %s2215_s24 = smov (!%p437_p2), 112   ;;  %vm1076_vm5 = vcmask (!%p437_p2), 523264  }
   0x8   : > { %2010 = vmatprep.subr.bf16.mxu1 (!%p437_p2), %v2210_v5  ;;  %2024 = vmatprep.mubr.msk.bf16.mxu0 (!%p437_p2), %vm2211_vm1, %v2210_v5  ;;  %v1878_v23 = vld [vmem:[%s2580_s4] ss:$0 sm:$0xff] (!%p437_p2)  ;;  %s2216_s27 = smov (!%p437_p2), 48   ;;  %vm1820_vm6 = vcmask (!%p437_p2), 785408  }
   0x9   : > { %v2154_v51 = vld [vmem:[%s2581_s5] sm:$0xff] (!%p437_p2)  }
   0xb   : > { %2011 = vmatpush3.bf16.msra.mxu1 (!%p437_p2), %v2153_v6  ;;  %v2155_v6 = vld [vmem:[%s2581_s5 + $0x8] sm:$0xff] (!%p437_p2)  }
   0xc   : > { %2016 = vmatprep.subr.bf16.mxu1 (!%p437_p2), %v2210_v5 }
   0xd   : > { %s2593_s19 = smov (!%p481_p3, %s1870_s19), 1 }
   0xe   : > { %s1875_s20 = sshll.u32 %s2593_s19, 3 }
   0xf   : > { %s484_s23 = scalar_lea.vmem %s2576_s0, %s1875_s20 }
  0x10   : > { %v489_v0 = vld [vmem:[%s484_s23] sm:$0xff]  ;;  %s2214_s23 = smov 80  }
  0x11   : > { %v493_v1 = vsel %vm492_vm0, %v489_v0, 0.0  ;;  %v498_v2 = vmul.f32 %v489_v0, %v489_v0 }
  0x12   : > { %494 = vadd.xlane.f32.xlu0 %v493_v1 }
  0x13   : > { %v499_v3 = vsel %vm492_vm0, %v498_v2, 0.0 }
  0x16   : > { %500 = vadd.xlane.f32.xlu0 %v499_v3 }
  0x9f   : > { %v495_v7 = vpop.xlane.xlu0 %494 }
  0xa0   : > { %v497_v8 = vmul.f32 0.03125, %v495_v7 }
  0xa2   : > { %v503_v10 = vmul.f32 %v497_v8, %v497_v8  ;;  %v506_v15 = vsub.f32 %v489_v0, %v497_v8 }
  0xa3   : > { %v501_v9 = vpop.xlane.xlu0 %500 }
  0xa4   : > { %v502_v11 = vmul.f32 0.03125, %v501_v9 }
  0xa6   : > { %v504_v12 = vsub.f32 %v502_v11, %v503_v10 }
  0xa8   : > { %v505_v13 = vmax.f32 %v504_v12, 0.0 }
  0xaa   : > { %v507_v14 = vadd.f32 1e-12, %v505_v13 }
  0xac   : > { %2172 = vrsqrt.f32 %v507_v14 }
  0xb6   : > { %v2173_v16 = vpop.eup %2172 }
  0xb7   : > { %v509_v18 = vmul.f32 %v2173_v16, %v506_v15 }
  0xb9   : > { %v516_v20 = vmul.f32 %v1876_v17, %v509_v18 }
  0xbb   : > { %v2334_v21 = vadd.f32 %v1877_v19, %v516_v20  ;;  %v1886_v20 = vld [vmem:[%s2582_s6] ss:$0 sm:$0xff] }
  0xbd   : > { %v524_v22 = vpack.c.bf16 %v2334_v21, %v2334_v21 }
  0xbf   : > { %2013 = vmatmul.mubr.msk.bf16.vlgmr.msra.gmra.mrb[0].mxu1 %vm492_vm0, %v524_v22 }
  0xc0   : > { %2018 = vmatprep.mubr.msk.bf16.mxu1 %vm2211_vm1, %v2210_v5 }
 0x192   : > { %v585_v24 = vpop.f32.mrb[0].mxu1 }
 0x193   : > { %v586_v25 = vadd.f32 %v1878_v23, %v585_v24  ;;  %v2014_v26 = vpop.f32.mrb[1].mxu1 }
 0x194   : > { %v588_v27 = vpop.f32.mrb[2].mxu1 }
 0x195   : > { %v2344_v28 = vpack.c.bf16 %v586_v25, %v586_v25  ;;  %v2015_v29 = vpop.f32.mrb[3].mxu1 }
 0x197   : > { %660 = vrot.lane.b32.xlu0 %v2344_v28, %s2212_s21  ;;  %598 = vrot.lane.b32.xlu1 %v2344_v28, %s2213_s22 }
 0x209   : > { %v661_v30 = vpop.permute.xlu0 %660  ;;  %v599_v31 = vpop.permute.xlu1 %598 }
 0x20a   : > { %v605_v32 = vsel %vm600_vm2, %v599_v31, 0  ;;  %v667_v33 = vsel %vm665_vm3, %v661_v30, 0 }
 0x20b   : > { %2017 = vmatpush3.bf16.xpose.msra.mxu1 %v605_v32  ;;  %2023 = vmatpush3.bf16.msra.mxu0 %v667_v33  ;;  %v2156_v32 = vld [vmem:[%s2585_s9] sm:$0xff]   ;;  %v2157_v33 = vld [vmem:[%s2585_s9 + $0x8] sm:$0xff]  }
 0x20c   : > { %2034 = vmatprep.subr.bf16.mxu0 %v2210_v5  ;;  %2028 = vmatprep.subr.bf16.mxu1 %v2210_v5 }
 0x212   : > { %2019 = vmatmul.mubr.msk.bf16.vlgmr.msra.gmra.mrb[4].mxu1 %vm600_vm2, %v2344_v28 }
 0x213   : > { %2030 = vmatprep.mubr.msk.bf16.mxu1 %vm2211_vm1, %v2210_v5  ;;  %2029 = vmatpush3.bf16.msra.mxu1 %v2154_v51  ;;  %v2160_v51 = vld [vmem:[%s2587_s11 + $0x10] sm:$0xff]  }
 0x214   : > { %2040 = vmatprep.subr.bf16.mxu1 %v2210_v5 }
 0x2e5   : > { %v641_v34 = vpop.f32.mrb[4].mxu1 }
 0x2e6   : > { %v2020_v35 = vpop.f32.mrb[5].mxu1  ;;  %v648_v36 = vsel %vm647_vm4, %v641_v34, -inf }
 0x2e7   : > { %649 = vmax.xlane.f32.xlu1 %v648_v36  ;;  %v644_v37 = vpop.f32.mrb[6].mxu1 }
 0x2e8   : > { %v2021_v38 = vpop.f32.mrb[7].mxu1 }
 0x374   : > { %v650_v39 = vpop.xlane.xlu1 %649 }
 0x375   : > { %v651_v40 = vsub.f32 %v641_v34, %v650_v39 }
 0x377   : > { %v652_v41 = vmul.f32 1.442695, %v651_v40 }
 0x379   : > { %2174 = vpow2.f32 %v652_v41 }
 0x383   : > { %v2175_v42 = vpop.eup %2174 }
 0x384   : > { %v654_v43 = vsel %vm647_vm4, %v2175_v42, 0.0 }
 0x385   : > { %655 = vadd.xlane.f32.xlu0 %v654_v43  ;;  %v1891_v43 = vld [vmem:[%s2583_s7] ss:$0 sm:$0xff] }
 0x39b   : > { %768 = vrot.lane.b32.xlu0 %v2344_v28, %s2214_s23 }
 0x39f   : > { %766 = vrot.lane.b32.xlu0 %v2344_v28, %s2215_s24 }
 0x412   : > { %v656_v44 = vpop.xlane.xlu0 %655 }
 0x413   : > { %2176 = vrcp.f32 %v656_v44 }
 0x416   : > { %v769_v47 = vpop.permute.xlu0 %768 }
 0x417   : > { %v774_v49 = vsel %vm600_vm2, %v769_v47, 0 }
 0x41a   : > { %v767_v50 = vpop.permute.xlu0 %766 }
 0x41d   : > { %v2177_v45 = vpop.eup %2176 }
 0x41e   : > { %v658_v46 = vmul.f32 %v2177_v45, %v2175_v42  ;;  %v1892_v45 = vld [vmem:[%s2584_s8] ss:$0 sm:$0xff] }
 0x420   : > { %v659_v48 = vpack.c.bf16 %v658_v46, %v658_v46 }
 0x422   : > { %2025 = vmatmul.mubr.msk.bf16.vlgmr.msra.gmra.mrb[0].mxu0 %vm647_vm4, %v659_v48 }
 0x423   : > { %2035 = vmatpush3.bf16.xpose.msra.mxu0 %v774_v49  ;;  %2036 = vmatprep.mubr.msk.bf16.mxu0 %vm2211_vm1, %v2210_v5  ;;  %v2158_v49 = vld [vmem:[%s2587_s11] sm:$0xff]  }
 0x424   : > { %2046 = vmatprep.subr.bf16.mxu0 %v2210_v5 }
 0x42a   : > { %2037 = vmatmul.mubr.msk.bf16.vlgmr.msra.gmra.mrb[4].mxu0 %vm600_vm2, %v767_v50  ;;  %v2159_v50 = vld [vmem:[%s2587_s11 + $0x8] sm:$0xff]  }
 0x42b   : > { %2048 = vmatprep.mubr.msk.bf16.mxu0 %vm2211_vm1, %v2210_v5  ;;  %2047 = vmatpush3.bf16.msra.mxu0 %v2155_v6  ;;  %v1897_v6 = vld [vmem:[%s2588_s12] ss:$0 sm:$0xff] }
 0x42c   : > { %2060 = vmatprep.subr.bf16.mxu0 %v2210_v5 }
 0x4f5   : > { %v703_v52 = vpop.f32.mrb[0].mxu0 }
 0x4f6   : > { %v709_v53 = vpack.c.bf16 %v703_v52, %v703_v52  ;;  %v2026_v54 = vpop.f32.mrb[1].mxu0  ;;  %v2161_v52 = vld [vmem:[%s2587_s11 + $0x18] sm:$0xff]  }
 0x4f7   : > { %v706_v55 = vpop.f32.mrb[2].mxu0 }
 0x4f8   : > { %v2027_v56 = vpop.f32.mrb[3].mxu0  ;;  %2031 = vmatmul.mubr.msk.bf16.vlgmr.msra.gmra.mrb[8].mxu1 %vm600_vm2, %v709_v53  ;;  %v1893_v53 = vld [vmem:[%s2586_s10] ss:$0 sm:$0xff] }
 0x4f9   : > { %2042 = vmatprep.mubr.msk.bf16.mxu1 %vm2211_vm1, %v2210_v5 }
 0x4fd   : > { %v810_v57 = vpop.f32.mrb[4].mxu0 }
 0x4fe   : > { %v2038_v58 = vpop.f32.mrb[5].mxu0  ;;  %v816_v59 = vsel %vm647_vm4, %v810_v57, -inf }
 0x4ff   : > { %817 = vmax.xlane.f32.xlu1 %v816_v59  ;;  %v813_v60 = vpop.f32.mrb[6].mxu0 }
 0x500   : > { %v2039_v61 = vpop.f32.mrb[7].mxu0 }
 0x510   : > { %828 = vrot.lane.b32.xlu1 %v2344_v28, %s2216_s27 }
 0x58c   : > { %v818_v62 = vpop.xlane.xlu1 %817 }
 0x58d   : > { %v819_v63 = vsub.f32 %v810_v57, %v818_v62 }
 0x58f   : > { %v820_v0 = vmul.f32 1.442695, %v819_v63 }
 0x590   : > { %v829_v1 = vpop.permute.xlu1 %828 }
 0x591   : > { %2178 = vpow2.f32 %v820_v0  ;;  %v834_v2 = vsel %vm665_vm3, %v829_v1, 0 }
 0x592   : > { %2041 = vmatpush3.bf16.msra.mxu1 %v834_v2 }
 0x593   : > { %2052 = vmatprep.subr.bf16.mxu1 %v2210_v5 }
 0x59b   : > { %v2179_v3 = vpop.eup %2178 }
 0x59c   : > { %v822_v4 = vsel %vm647_vm4, %v2179_v3, 0.0 }
 0x59d   : > { %823 = vadd.xlane.f32.xlu0 %v822_v4 }
 0x5cb   : > { %v753_v7 = vpop.f32.mrb[8].mxu1 }
 0x5cc   : > { %v2032_v8 = vpop.f32.mrb[9].mxu1  ;;  %v765_v22 = vadd.f32 %v1886_v20, %v753_v7 }
 0x5cd   : > { %v756_v9 = vpop.f32.mrb[10].mxu1 }
 0x5ce   : > { %v2033_v10 = vpop.f32.mrb[11].mxu1 }
 0x62a   : > { %v824_v11 = vpop.xlane.xlu0 %823 }
 0x62b   : > { %2180 = vrcp.f32 %v824_v11 }
 0x635   : > { %v2181_v12 = vpop.eup %2180 }
 0x636   : > { %v826_v13 = vmul.f32 %v2181_v12, %v2179_v3 }
 0x638   : > { %v827_v14 = vpack.c.bf16 %v826_v13, %v826_v13 }
 0x63a   : > { %2043 = vmatmul.mubr.msk.bf16.vlgmr.msra.gmra.mrb[12].mxu1 %vm647_vm4, %v827_v14 }
 0x63b   : > { %2056 = vmatprep.mubr.msk.bf16.mxu1 %vm2211_vm1, %v2210_v5  ;;  %2053 = vmatpush3.bf16.msra.mxu1 %v2156_v32 }
 0x63c   : > { %2054 = vmatprep.subr.bf16.mxu1 %v2210_v5 }
 0x63f   : > { %2055 = vmatpush3.bf16.msra.mxu1 %v2157_v33 }
 0x640   : > { %2072 = vmatprep.subr.bf16.mxu1 %v2210_v5 }
 0x70d   : > { %v870_v15 = vpop.f32.mrb[12].mxu1 }
 0x70e   : > { %v876_v16 = vpack.c.bf16 %v870_v15, %v870_v15  ;;  %v2044_v17 = vpop.f32.mrb[13].mxu1 }
 0x70f   : > { %v873_v18 = vpop.f32.mrb[14].mxu1  ;;  %v2163_v17 = vld [vmem:[%s2579_s3 + $0x18] sm:$0xff]  }
 0x710   : > { %v2045_v19 = vpop.f32.mrb[15].mxu1  ;;  %2049 = vmatmul.mubr.msk.bf16.vlgmr.msra.gmra.mrb[8].mxu0 %vm600_vm2, %v876_v16  ;;  %v2162_v16 = vld [vmem:[%s2579_s3 + $0x10] sm:$0xff]  }
 0x711   : > { %2068 = vmatprep.mubr.msk.bf16.mxu0 %vm2211_vm1, %v2210_v5  ;;  %2061 = vmatpush3.bf16.msra.mxu0 %v2158_v49 }
 0x712   : > { %2062 = vmatprep.subr.bf16.mxu0 %v2210_v5 }
 0x715   : > { %2063 = vmatpush3.bf16.msra.mxu0 %v2159_v50 }
 0x716   : > { %2064 = vmatprep.subr.bf16.mxu0 %v2210_v5 }
 0x719   : > { %2065 = vmatpush3.bf16.msra.mxu0 %v2160_v51 }
 0x71a   : > { %2066 = vmatprep.subr.bf16.mxu0 %v2210_v5 }
 0x71d   : > { %2067 = vmatpush3.bf16.msra.mxu0 %v2161_v52 }
 0x71e   : > { %2086 = vmatprep.subr.bf16.mxu0 %v2210_v5 }
 0x7e3   : > { %v920_v23 = vpop.f32.mrb[8].mxu0 }
 0x7e4   : > { %v926_v24 = vadd.f32 %v920_v23, %v765_v22  ;;  %v2050_v25 = vpop.f32.mrb[9].mxu0 }
 0x7e5   : > { %v923_v26 = vpop.f32.mrb[10].mxu0 }
 0x7e6   : > { %v927_v27 = vadd.f32 %v926_v24, %v2334_v21  ;;  %v2051_v28 = vpop.f32.mrb[11].mxu0 }
 0x7e8   : > { %v930_v29 = vsel %vm492_vm0, %v927_v27, 0.0  ;;  %v934_v30 = vmul.f32 %v927_v27, %v927_v27 }
 0x7e9   : > { %931 = vadd.xlane.f32.xlu1 %v930_v29  ;;  %v1903_v29 = vld [vmem:[%s2589_s13] ss:$0 sm:$0xff] }
 0x7ea   : > { %v935_v31 = vsel %vm492_vm0, %v934_v30, 0.0 }
 0x7eb   : > { %936 = vadd.xlane.f32.xlu0 %v935_v31  ;;  %v1904_v31 = vld [vmem:[%s2590_s14] ss:$0 sm:$0xff] }
 0x876   : > { %v932_v21 = vpop.xlane.xlu1 %931 }
 0x877   : > { %v933_v34 = vmul.f32 0.03125, %v932_v21 }
 0x878   : > { %v937_v35 = vpop.xlane.xlu0 %936 }
 0x879   : > { %v939_v36 = vmul.f32 %v933_v34, %v933_v34  ;;  %v938_v37 = vmul.f32 0.03125, %v937_v35  ;;  %v942_v41 = vsub.f32 %v927_v27, %v933_v34  ;;  %v1910_v34 = vld [vmem:[%s2580_s4 + $0x1] ss:$0 sm:$0xff] }
 0x87b   : > { %v940_v38 = vsub.f32 %v938_v37, %v939_v36 }
 0x87d   : > { %v941_v39 = vmax.f32 %v940_v38, 0.0 }
 0x87f   : > { %v943_v40 = vadd.f32 1e-12, %v941_v39 }
 0x881   : > { %2182 = vrsqrt.f32 %v943_v40 }
 0x88b   : > { %v2183_v42 = vpop.eup %2182 }
 0x88c   : > { %v945_v44 = vmul.f32 %v2183_v42, %v942_v41 }
 0x88e   : > { %v952_v46 = vmul.f32 %v1891_v43, %v945_v44 }
 0x890   : > { %v959_v47 = vadd.f32 %v1892_v45, %v952_v46 }
 0x892   : > { %v960_v48 = vpack.c.bf16 %v959_v47, %v959_v47 }
 0x894   : > { %2057 = vmatmul.mubr.msk.bf16.vlgmr.msra.gmra.mrb[16].mxu1 %vm492_vm0, %v960_v48 }
 0x895   : > { %2076 = vmatprep.mubr.msk.bf16.mxu1 %vm2211_vm1, %v2210_v5  ;;  %2073 = vmatpush3.bf16.msra.mxu1 %v2162_v16 }
 0x896   : > { %2074 = vmatprep.subr.bf16.mxu1 %v2210_v5 }
 0x899   : > { %2075 = vmatpush3.bf16.msra.mxu1 %v2163_v17  ;;  %v2165_v17 = vld [vmem:[%s2581_s5 + $0x18] sm:$0xff]  }
 0x89a   : > { %2080 = vmatprep.subr.bf16.mxu1 %v2210_v5 }
 0x967   : > { %v1021_v54 = vpop.f32.mrb[16].mxu1 }
 0x968   : > { %v1022_v55 = vadd.f32 %v1893_v53, %v1021_v54  ;;  %v2058_v56 = vpop.f32.mrb[17].mxu1 }
 0x969   : > { %v1024_v57 = vpop.f32.mrb[18].mxu1 }
 0x96a   : > { %v1027_v58 = vmul.f32 %v1022_v55, %v1022_v55  ;;  %v2059_v59 = vpop.f32.mrb[19].mxu1 }
 0x96c   : > { %v1028_v60 = vmul.f32 %v1027_v58, %v1022_v55 }
 0x96e   : > { %v1029_v61 = vmul.f32 0.044715, %v1028_v60 }
 0x970   : > { %v1030_v62 = vadd.f32 %v1029_v61, %v1022_v55 }
 0x972   : > { %v1031_v63 = vmul.f32 0.7978846, %v1030_v62  ;;  %v2164_v62 = vld [vmem:[%s2581_s5 + $0x10] sm:$0xff]  }
 0x974   : > { %2184 = vtanh.f32 %v1031_v63 }
 0x97e   : > { %v2185_v0 = vpop.eup %2184 }
 0x97f   : > { %v1033_v1 = vadd.f32 1.0, %v2185_v0 }
 0x981   : > { %v1034_v2 = vmul.f32 0.5, %v1033_v1 }
 0x983   : > { %v1035_v3 = vmul.f32 %v1034_v2, %v1022_v55 }
 0x985   : > { %v1036_v4 = vpack.c.bf16 %v1035_v3, %v1035_v3 }
 0x987   : > { %2069 = vmatmul.mubr.msk.bf16.vlgmr.msra.gmra.mrb[12].mxu0 %vm1076_vm5, %v1036_v4 }
 0x988   : > { %2088 = vmatprep.mubr.msk.bf16.mxu0 %vm2211_vm1, %v2210_v5 }
 0xa5a   : > { %v1114_v7 = vpop.f32.mrb[12].mxu0 }
 0xa5b   : > { %v1115_v8 = vadd.f32 %v1897_v6, %v1114_v7  ;;  %v2070_v9 = vpop.f32.mrb[13].mxu0 }
 0xa5c   : > { %v1117_v10 = vpop.f32.mrb[14].mxu0 }
 0xa5d   : > { %v1120_v11 = vadd.f32 %v1115_v8, %v959_v47  ;;  %v2071_v12 = vpop.f32.mrb[15].mxu0 }
 0xa5f   : > { %v1123_v13 = vsel %vm492_vm0, %v1120_v11, 0.0  ;;  %v1127_v14 = vmul.f32 %v1120_v11, %v1120_v11 }
 0xa60   : > { %1124 = vadd.xlane.f32.xlu0 %v1123_v13 }
 0xa61   : > { %v1128_v15 = vsel %vm492_vm0, %v1127_v14, 0.0 }
 0xa64   : > { %1129 = vadd.xlane.f32.xlu0 %v1128_v15 }
 0xaed   : > { %v1125_v18 = vpop.xlane.xlu0 %1124 }
 0xaee   : > { %v1126_v19 = vmul.f32 0.03125, %v1125_v18 }
 0xaf0   : > { %v1132_v22 = vmul.f32 %v1126_v19, %v1126_v19  ;;  %v1135_v27 = vsub.f32 %v1120_v11, %v1126_v19 }
 0xaf1   : > { %v1130_v20 = vpop.xlane.xlu0 %1129 }
 0xaf2   : > { %v1131_v23 = vmul.f32 0.03125, %v1130_v20 }
 0xaf4   : > { %v1133_v24 = vsub.f32 %v1131_v23, %v1132_v22 }
 0xaf6   : > { %v1134_v25 = vmax.f32 %v1133_v24, 0.0 }
 0xaf8   : > { %v1136_v26 = vadd.f32 1e-12, %v1134_v25 }
 0xafa   : > { %2186 = vrsqrt.f32 %v1136_v26 }
 0xb04   : > { %v2187_v28 = vpop.eup %2186 }
 0xb05   : > { %v1138_v30 = vmul.f32 %v2187_v28, %v1135_v27 }
 0xb07   : > { %v1145_v32 = vmul.f32 %v1903_v29, %v1138_v30 }
 0xb09   : > { %v2459_v33 = vadd.f32 %v1904_v31, %v1145_v32  ;;  %v1923_v32 = vld [vmem:[%s2582_s6 + $0x1] ss:$0 sm:$0xff] }
 0xb0b   : > { %v1162_v21 = vpack.c.bf16 %v2459_v33, %v2459_v33 }
 0xb0d   : > { %2077 = vmatmul.mubr.msk.bf16.vlgmr.msra.gmra.mrb[20].mxu1 %vm492_vm0, %v1162_v21 }
 0xb0e   : > { %2082 = vmatprep.mubr.msk.bf16.mxu1 %vm2211_vm1, %v2210_v5 }
 0xbe0   : > { %v1225_v35 = vpop.f32.mrb[20].mxu1 }
 0xbe1   : > { %v1226_v36 = vadd.f32 %v1910_v34, %v1225_v35  ;;  %v2078_v37 = vpop.f32.mrb[21].mxu1 }
 0xbe2   : > { %v1228_v38 = vpop.f32.mrb[22].mxu1 }
 0xbe3   : > { %v1238_v39 = vpack.c.bf16 %v1226_v36, %v1226_v36  ;;  %v2079_v40 = vpop.f32.mrb[23].mxu1 }
 0xbe5   : > { %1240 = vrot.lane.b32.xlu0 %v1238_v39, %s2213_s22 }
 0xbe9   : > { %1407 = vrot.lane.b32.xlu0 %v1238_v39, %s2214_s23  ;;  %s487_s23 = scalar_lea.vmem %s2591_s15, %s2593_s19 }
 0xbed   : > { %1405 = vrot.lane.b32.xlu0 %v1238_v39, %s2215_s24 }
 0xc57   : > { %v1241_v41 = vpop.permute.xlu0 %1240 }
 0xc58   : > { %v1246_v42 = vsel %vm600_vm2, %v1241_v41, 0 }
 0xc59   : > { %2081 = vmatpush3.bf16.xpose.msra.mxu1 %v1246_v42 }
 0xc5a   : > { %2092 = vmatprep.subr.bf16.mxu1 %v2210_v5 }
 0xc5b   : > { %v1408_v58 = vpop.permute.xlu0 %1407 }
 0xc5c   : > { %v1413_v60 = vsel %vm600_vm2, %v1408_v58, 0 }
 0xc5f   : > { %v1406_v61 = vpop.permute.xlu0 %1405 }
 0xc60   : > { %2083 = vmatmul.mubr.msk.bf16.vlgmr.msra.gmra.mrb[24].mxu1 %vm600_vm2, %v1238_v39 }
 0xc61   : > { %2094 = vmatprep.mubr.msk.bf16.mxu1 %vm2211_vm1, %v2210_v5  ;;  %2093 = vmatpush3.bf16.msra.mxu1 %v2164_v62  ;;  %v2169_v62 = vld [vmem:[%s2587_s11 + $0x28] sm:$0xff]  }
 0xc62   : > { %2104 = vmatprep.subr.bf16.mxu1 %v2210_v5 }
 0xd33   : > { %v1282_v43 = vpop.f32.mrb[24].mxu1 }
 0xd34   : > { %v2084_v44 = vpop.f32.mrb[25].mxu1  ;;  %v1288_v45 = vsel %vm647_vm4, %v1282_v43, -inf }
 0xd35   : > { %1289 = vmax.xlane.f32.xlu1 %v1288_v45  ;;  %v1285_v46 = vpop.f32.mrb[26].mxu1  ;;  %v2167_v44 = vld [vmem:[%s2585_s9 + $0x18] sm:$0xff]  }
 0xd36   : > { %v2085_v47 = vpop.f32.mrb[27].mxu1 }
 0xdc2   : > { %v1290_v48 = vpop.xlane.xlu1 %1289 }
 0xdc3   : > { %v1291_v49 = vsub.f32 %v1282_v43, %v1290_v48  ;;  %v2166_v43 = vld [vmem:[%s2585_s9 + $0x10] sm:$0xff]  }
 0xdc5   : > { %v1292_v50 = vmul.f32 1.442695, %v1291_v49 }
 0xdc7   : > { %2188 = vpow2.f32 %v1292_v50 }
 0xdd1   : > { %v2189_v51 = vpop.eup %2188 }
 0xdd2   : > { %v1294_v52 = vsel %vm647_vm4, %v2189_v51, 0.0 }
 0xdd3   : > { %1295 = vadd.xlane.f32.xlu1 %v1294_v52 }
 0xde4   : > { %1300 = vrot.lane.b32.xlu1 %v1238_v39, %s2212_s21 }
 0xe60   : > { %v1296_v53 = vpop.xlane.xlu1 %1295 }
 0xe61   : > { %2190 = vrcp.f32 %v1296_v53 }
 0xe64   : > { %v1301_v54 = vpop.permute.xlu1 %1300 }
 0xe65   : > { %v1306_v55 = vsel %vm665_vm3, %v1301_v54, 0 }
 0xe66   : > { %2087 = vmatpush3.bf16.msra.mxu0 %v1306_v55  ;;  %v1930_v55 = vld [vmem:[%s2583_s7 + $0x1] ss:$0 sm:$0xff] }
 0xe67   : > { %2098 = vmatprep.subr.bf16.mxu0 %v2210_v5 }
 0xe6b   : > { %v2191_v56 = vpop.eup %2190 }
 0xe6c   : > { %v1298_v57 = vmul.f32 %v2191_v56, %v2189_v51 }
 0xe6e   : > { %v1299_v59 = vpack.c.bf16 %v1298_v57, %v1298_v57  ;;  %v1931_v57 = vld [vmem:[%s2584_s8 + $0x1] ss:$0 sm:$0xff] }
 0xe70   : > { %2089 = vmatmul.mubr.msk.bf16.vlgmr.msra.gmra.mrb[16].mxu0 %vm647_vm4, %v1299_v59 }
 0xe71   : > { %2099 = vmatpush3.bf16.xpose.msra.mxu0 %v1413_v60  ;;  %2100 = vmatprep.mubr.msk.bf16.mxu0 %vm2211_vm1, %v2210_v5 }
 0xe72   : > { %2110 = vmatprep.subr.bf16.mxu0 %v2210_v5 }
 0xe78   : > { %2101 = vmatmul.mubr.msk.bf16.vlgmr.msra.gmra.mrb[20].mxu0 %vm600_vm2, %v1406_v61  ;;  %v2168_v61 = vld [vmem:[%s2587_s11 + $0x20] sm:$0xff]  }
 0xe79   : > { %2112 = vmatprep.mubr.msk.bf16.mxu0 %vm2211_vm1, %v2210_v5  ;;  %2111 = vmatpush3.bf16.msra.mxu0 %v2165_v17  ;;  %v1153_v17 = vsel %vm492_vm0, %v2459_v33, 0.0 }
 0xe7a   : > { %2124 = vmatprep.subr.bf16.mxu0 %v2210_v5 }
 0xf43   : > { %v1342_v63 = vpop.f32.mrb[16].mxu0 }
 0xf44   : > { %v1348_v0 = vpack.c.bf16 %v1342_v63, %v1342_v63  ;;  %v2090_v1 = vpop.f32.mrb[17].mxu0  ;;  %v2170_v63 = vld [vmem:[%s2587_s11 + $0x30] sm:$0xff]  }
 0xf45   : > { %v1345_v2 = vpop.f32.mrb[18].mxu0  ;;  %v1937_v1 = vld [vmem:[%s2586_s10 + $0x1] ss:$0 sm:$0xff] }
 0xf46   : > { %v2091_v3 = vpop.f32.mrb[19].mxu0  ;;  %2095 = vmatmul.mubr.msk.bf16.vlgmr.msra.gmra.mrb[28].mxu1 %vm600_vm2, %v1348_v0  ;;  %v2171_v0 = vld [vmem:[%s2587_s11 + $0x38] sm:$0xff]  }
 0xf47   : > { %2106 = vmatprep.mubr.msk.bf16.mxu1 %vm2211_vm1, %v2210_v5 }
 0xf4b   : > { %v1449_v4 = vpop.f32.mrb[20].mxu0 }
 0xf4c   : > { %v2102_v6 = vpop.f32.mrb[21].mxu0  ;;  %v1455_v7 = vsel %vm647_vm4, %v1449_v4, -inf }
 0xf4d   : > { %1456 = vmax.xlane.f32.xlu0 %v1455_v7  ;;  %v1452_v8 = vpop.f32.mrb[22].mxu0 }
 0xf4e   : > { %v2103_v9 = vpop.f32.mrb[23].mxu0 }
 0xf63   : > { %1467 = vrot.lane.b32.xlu0 %v1238_v39, %s2216_s27  ;;  %s2217_s27 = smov 32  }
 0xfda   : > { %v1457_v10 = vpop.xlane.xlu0 %1456 }
 0xfdb   : > { %v1458_v11 = vsub.f32 %v1449_v4, %v1457_v10 }
 0xfdd   : > { %v1459_v12 = vmul.f32 1.442695, %v1458_v11 }
 0xfde   : > { %v1468_v13 = vpop.permute.xlu0 %1467 }
 0xfdf   : > { %2192 = vpow2.f32 %v1459_v12  ;;  %v1473_v14 = vsel %vm665_vm3, %v1468_v13, 0 }
 0xfe0   : > { %2105 = vmatpush3.bf16.msra.mxu1 %v1473_v14 }
 0xfe1   : > { %2116 = vmatprep.subr.bf16.mxu1 %v2210_v5 }
 0xfe9   : > { %v2193_v15 = vpop.eup %2192 }
 0xfea   : > { %v1461_v16 = vsel %vm647_vm4, %v2193_v15, 0.0 }
 0xfeb   : > { %1462 = vadd.xlane.f32.xlu1 %v1461_v16 }
0x1019   : > { %v1392_v18 = vpop.f32.mrb[28].mxu1 }
0x101a   : > { %v2096_v19 = vpop.f32.mrb[29].mxu1  ;;  %v1404_v21 = vadd.f32 %v1923_v32, %v1392_v18  ;;  %v1154_v18 = vrot.slane %v1153_v17, 4 }
0x101b   : > { %v1395_v20 = vpop.f32.mrb[30].mxu1  ;;  %v1950_v19 = vld [vmem:[%s2588_s12 + $0x1] ss:$0 sm:$0xff] }
0x101c   : > { %v2097_v22 = vpop.f32.mrb[31].mxu1 }
0x1078   : > { %v1463_v23 = vpop.xlane.xlu1 %1462 }
0x1079   : > { %2194 = vrcp.f32 %v1463_v23 }
0x1083   : > { %v2195_v24 = vpop.eup %2194 }
0x1084   : > { %v1465_v25 = vmul.f32 %v2195_v24, %v2193_v15  ;;  %v1155_v24 = vadd.f32 %v1154_v18, %v1153_v17 }
0x1086   : > { %v1466_v26 = vpack.c.bf16 %v1465_v25, %v1465_v25 }
0x1088   : > { %2107 = vmatmul.mubr.msk.bf16.vlgmr.msra.gmra.mrb[32].mxu1 %vm647_vm4, %v1466_v26 }
0x1089   : > { %2120 = vmatprep.mubr.msk.bf16.mxu1 %vm2211_vm1, %v2210_v5  ;;  %2117 = vmatpush3.bf16.msra.mxu1 %v2166_v43 }
0x108a   : > { %2118 = vmatprep.subr.bf16.mxu1 %v2210_v5 }
0x108d   : > { %2119 = vmatpush3.bf16.msra.mxu1 %v2167_v44 }
0x115b   : > { %v1509_v27 = vpop.f32.mrb[32].mxu1 }
0x115c   : > { %v1515_v28 = vpack.c.bf16 %v1509_v27, %v1509_v27  ;;  %v2108_v29 = vpop.f32.mrb[33].mxu1 }
0x115d   : > { %v1512_v30 = vpop.f32.mrb[34].mxu1 }
0x115e   : > { %v2109_v31 = vpop.f32.mrb[35].mxu1  ;;  %2113 = vmatmul.mubr.msk.bf16.vlgmr.msra.gmra.mrb[24].mxu0 %vm600_vm2, %v1515_v28  ;;  %v1156_v30 = vrot.slane %v1155_v24, 2 }
0x115f   : > { %2132 = vmatprep.mubr.msk.bf16.mxu0 %vm2211_vm1, %v2210_v5  ;;  %2125 = vmatpush3.bf16.msra.mxu0 %v2168_v61 }
0x1160   : > { %2126 = vmatprep.subr.bf16.mxu0 %v2210_v5 }
0x1163   : > { %2127 = vmatpush3.bf16.msra.mxu0 %v2169_v62 }
0x1164   : > { %2128 = vmatprep.subr.bf16.mxu0 %v2210_v5 }
0x1167   : > { %2129 = vmatpush3.bf16.msra.mxu0 %v2170_v63 }
0x1168   : > { %2130 = vmatprep.subr.bf16.mxu0 %v2210_v5 }
0x116b   : > { %2131 = vmatpush3.bf16.msra.mxu0 %v2171_v0 }
0x1231   : > { %v1559_v34 = vpop.f32.mrb[24].mxu0 }
0x1232   : > { %v1565_v35 = vadd.f32 %v1559_v34, %v1404_v21  ;;  %v2114_v36 = vpop.f32.mrb[25].mxu0 }
0x1233   : > { %v1562_v37 = vpop.f32.mrb[26].mxu0 }
0x1234   : > { %v1566_v38 = vadd.f32 %v1565_v35, %v2459_v33  ;;  %v2115_v39 = vpop.f32.mrb[27].mxu0  ;;  %v1157_v33 = vadd.f32 %v1156_v30, %v1155_v24 }
0x1236   : > { %v1571_v40 = vsel %vm492_vm0, %v1566_v38, 0.0  ;;  %v1575_v41 = vmul.f32 %v1566_v38, %v1566_v38  ;;  %v1158_v32 = vrot.slane %v1157_v33, 1 }
0x1237   : > { %1572 = vadd.xlane.f32.xlu1 %v1571_v40 }
0x1238   : > { %v1576_v42 = vsel %vm492_vm0, %v1575_v41, 0.0  ;;  %v1159_v21 = vadd.f32 %v1158_v32, %v1157_v33 }
0x123a   : > { %v1161_v34 = vmul.f32 0.125, %v1159_v21 }
0x123b   : > { %1577 = vadd.xlane.f32.xlu1 %v1576_v42 }
0x12c4   : > { %v1573_v45 = vpop.xlane.xlu1 %1572 }
0x12c5   : > { %v1574_v46 = vmul.f32 0.03125, %v1573_v45  ;;  %v1958_v45 = vld [vmem:[%s2589_s13 + $0x1] ss:$0 sm:$0xff] }
0x12c7   : > { %v1580_v48 = vmul.f32 %v1574_v46, %v1574_v46  ;;  %v1583_v53 = vsub.f32 %v1566_v38, %v1574_v46 }
0x12c8   : > { %v1578_v47 = vpop.xlane.xlu1 %1577 }
0x12c9   : > { %v1579_v49 = vmul.f32 0.03125, %v1578_v47  ;;  %v1959_v47 = vld [vmem:[%s2590_s14 + $0x1] ss:$0 sm:$0xff] }
0x12cb   : > { %v1581_v50 = vsub.f32 %v1579_v49, %v1580_v48 }
0x12cd   : > { %v1582_v51 = vmax.f32 %v1581_v50, 0.0 }
0x12cf   : > { %v1584_v52 = vadd.f32 1e-12, %v1582_v51 }
0x12d1   : > { %2196 = vrsqrt.f32 %v1584_v52 }
0x12db   : > { %v2197_v54 = vpop.eup %2196 }
0x12dc   : > { %v1586_v56 = vmul.f32 %v2197_v54, %v1583_v53 }
0x12de   : > { %v1593_v58 = vmul.f32 %v1930_v55, %v1586_v56 }
0x12e0   : > { %v1600_v59 = vadd.f32 %v1931_v57, %v1593_v58 }
0x12e2   : > { %v1601_v60 = vpack.c.bf16 %v1600_v59, %v1600_v59 }
0x12e4   : > { %2121 = vmatmul.mubr.msk.bf16.vlgmr.msra.gmra.mrb[36].mxu1 %vm492_vm0, %v1601_v60 }
0x13b7   : > { %v1664_v2 = vpop.f32.mrb[36].mxu1 }
0x13b8   : > { %v1665_v3 = vadd.f32 %v1937_v1, %v1664_v2  ;;  %v2122_v4 = vpop.f32.mrb[37].mxu1 }
0x13b9   : > { %v1667_v6 = vpop.f32.mrb[38].mxu1 }
0x13ba   : > { %v1670_v7 = vmul.f32 %v1665_v3, %v1665_v3  ;;  %v2123_v8 = vpop.f32.mrb[39].mxu1 }
0x13bc   : > { %v1671_v9 = vmul.f32 %v1670_v7, %v1665_v3 }
0x13be   : > { %v1672_v10 = vmul.f32 0.044715, %v1671_v9 }
0x13c0   : > { %v1673_v11 = vadd.f32 %v1672_v10, %v1665_v3 }
0x13c2   : > { %v1674_v12 = vmul.f32 0.7978846, %v1673_v11 }
0x13c4   : > { %2198 = vtanh.f32 %v1674_v12 }
0x13ce   : > { %v2199_v5 = vpop.eup %2198 }
0x13cf   : > { %v1676_v13 = vadd.f32 1.0, %v2199_v5 }
0x13d1   : > { %v1677_v14 = vmul.f32 0.5, %v1676_v13 }
0x13d3   : > { %v1678_v15 = vmul.f32 %v1677_v14, %v1665_v3 }
0x13d5   : > { %v1679_v16 = vpack.c.bf16 %v1678_v15, %v1678_v15 }
0x13d7   : > { %2133 = vmatmul.mubr.msk.bf16.vlgmr.msra.gmra.mrb[28].mxu0 %vm1076_vm5, %v1679_v16 }
0x14aa   : > { %v1758_v20 = vpop.f32.mrb[28].mxu0 }
0x14ab   : > { %v1759_v22 = vadd.f32 %v1950_v19, %v1758_v20  ;;  %v2134_v23 = vpop.f32.mrb[29].mxu0 }
0x14ac   : > { %v1761_v25 = vpop.f32.mrb[30].mxu0 }
0x14ad   : > { %v1764_v26 = vadd.f32 %v1759_v22, %v1600_v59  ;;  %v2135_v27 = vpop.f32.mrb[31].mxu0 }
0x14af   : > { %v1769_v28 = vsel %vm492_vm0, %v1764_v26, 0.0  ;;  %v1773_v29 = vmul.f32 %v1764_v26, %v1764_v26 }
0x14b0   : > { %1770 = vadd.xlane.f32.xlu1 %v1769_v28 }
0x14b1   : > { %v1774_v31 = vsel %vm492_vm0, %v1773_v29, 0.0 }
0x14b2   : > { %1775 = vadd.xlane.f32.xlu0 %v1774_v31 }
0x14c1   : > { %1808 = vrot.lane.b32.xlu1 %v1161_v34, %s2217_s27 }
0x153d   : > { %v1771_v35 = vpop.xlane.xlu1 %1770 }
0x153e   : > { %v1772_v36 = vmul.f32 0.03125, %v1771_v35 }
0x153f   : > { %v1776_v37 = vpop.xlane.xlu0 %1775 }
0x1540   : > { %v1778_v38 = vmul.f32 %v1772_v36, %v1772_v36  ;;  %v1777_v39 = vmul.f32 0.03125, %v1776_v37  ;;  %v1781_v43 = vsub.f32 %v1764_v26, %v1772_v36 }
0x1541   : > { %v1809_v58 = vpop.permute.xlu1 %1808 }
0x1542   : > { %v1779_v40 = vsub.f32 %v1777_v39, %v1778_v38 }
0x1544   : > { %v1780_v41 = vmax.f32 %v1779_v40, 0.0 }
0x1546   : > { %v1782_v42 = vadd.f32 1e-12, %v1780_v41 }
0x1548   : > { %2200 = vrsqrt.f32 %v1782_v42 }
0x1552   : > { %v2201_v44 = vpop.eup %2200 }
0x1553   : > { %v1784_v46 = vmul.f32 %v2201_v44, %v1781_v43 }
0x1555   : > { %v1791_v48 = vmul.f32 %v1958_v45, %v1784_v46 }
0x1557   : > { %v1798_v49 = vadd.f32 %v1959_v47, %v1791_v48 }
0x1559   : > { %v1799_v50 = vsel %vm492_vm0, %v1798_v49, 0.0  ;;  %v1818_v60 = vsel %vm492_vm0, %v1798_v49, %v1809_v58 }
0x155a   : > { %v1800_v51 = vrot.slane %v1799_v50, 4 }
0x155c   : > { %v1801_v52 = vadd.f32 %v1800_v51, %v1799_v50 }
0x155e   : > { %v1802_v53 = vrot.slane %v1801_v52, 2 }
0x1560   : > { %v1803_v54 = vadd.f32 %v1802_v53, %v1801_v52 }
0x1562   : > { %v1804_v55 = vrot.slane %v1803_v54, 1 }
0x1564   : > { %v1805_v56 = vadd.f32 %v1804_v55, %v1803_v54 }
0x1566   : > { %v1806_v57 = vmul.f32 0.125, %v1805_v56 }
0x1568   : > { %1812 = vrot.lane.b32.xlu1 %v1806_v57, %s2212_s21 }
0x156c   : > { %1815 = vrot.lane.b32.xlu1 %v1806_v57, %s2213_s22 }
0x15da   : > { %v1813_v59 = vpop.permute.xlu1 %1812 }
0x15db   : > { %v1819_v61 = vsel %vm1076_vm5, %v1818_v60, %v1813_v59 }
0x15de   : > { %v1816_v62 = vpop.permute.xlu1 %1815 }
0x15df   : > { %v1821_v63 = vsel %vm1820_vm6, %v1819_v61, %v1816_v62 }
0x15e0   : > { %1822 = vst [vmem:[%s487_s23] sm:$0x1] %v1821_v63 }
0x15e1 PF: > { %s25_s18 = sadd.s32 1, %s2208_s18  }
0x15e2   : > { %p22_p4 = scmp.ge.s32.totalorder %s25_s18, 4  }
0x15e4   :  { %24 = sbr.rel (!%p22_p4) target bundleno = 1 (0x1), region = 122 }

</bundles_post_ra>
